<compile_context>
chip_gen: v5e
topology: v5e:2x2
jax: 0.10.0
libtpu: 0.0.40
codegen_flags: <defaults>
</compile_context>

<pallas_src>
import functools
import math

import jax
import jax.numpy as jnp
from jax.experimental import pallas as pl
from jax.experimental.pallas import tpu as pltpu


def encoder_layer_kernel(
    x_ref,
    wq_ref, bq_ref, wk_ref, bk_ref, wv_ref, bv_ref, wo_ref, bo_ref,
    w1_ref, b1_ref, w2_ref, b2_ref,
    g1_ref, beta1_ref, g2_ref, beta2_ref,
    out_ref,
    *, num_heads: int,
):
    """One grid step = one batch element's full encoder layer (attention + FFN)."""
    x_bf = x_ref[...]                              # (S, D) bf16
    S, D = x_bf.shape
    depth = D // num_heads
    scale = 1.0 / math.sqrt(depth)
    x32 = x_bf.astype(jnp.float32)

    # --- QKV projections: bf16 MXU operands, f32 accumulation + f32 bias ---
    q = jnp.dot(x_bf, wq_ref[...], preferred_element_type=jnp.float32) + bq_ref[...]
    k = jnp.dot(x_bf, wk_ref[...], preferred_element_type=jnp.float32) + bk_ref[...]
    v = jnp.dot(x_bf, wv_ref[...], preferred_element_type=jnp.float32) + bv_ref[...]
    q_bf = q.astype(jnp.bfloat16)
    k_bf = k.astype(jnp.bfloat16)
    v_bf = v.astype(jnp.bfloat16)

    wo = wo_ref[...]                               # (D, D) bf16

    # --- Per-head attention with the output projection fused into the loop.
    # mask=None path only (an additive mask would need one extra input ref).
    # TODO(synk): at production S, switch to flash-style query tiling (grid over
    #             (B, H, S//TQ) with online softmax) instead of the (S, S) logits tile.
    # TODO(synk): at production B*H, keep q/k/v in a lane-dense (H, S, depth) layout
    #             (or a head grid axis) instead of depth-wide column slices.
    dn = (((1,), (1,)), ((), ()))                  # contract last axis of both (no .T)
    attn = jnp.zeros((S, D), jnp.float32)
    for h in range(num_heads):
        c0 = h * depth
        qh = q_bf[:, c0:c0 + depth]                # (S, depth) bf16
        kh = k_bf[:, c0:c0 + depth]
        vh = v_bf[:, c0:c0 + depth]
        logits = jax.lax.dot_general(
            qh, kh, dn, preferred_element_type=jnp.float32) * scale   # (S, S) f32
        logits = logits - jnp.max(logits, axis=-1, keepdims=True)
        e = jnp.exp(logits)
        inv = pl.reciprocal(jnp.sum(e, axis=-1, keepdims=True), approx=True)
        p = (e * inv).astype(jnp.bfloat16)
        oh = jnp.dot(p, vh, preferred_element_type=jnp.float32)        # (S, depth)
        attn = attn + jnp.dot(oh.astype(jnp.bfloat16), wo[c0:c0 + depth, :],
                              preferred_element_type=jnp.float32)
    attn_out = attn + bo_ref[...]

    # dropout1: identity (eval mode)
    h1 = x32 + attn_out
    mu1 = jnp.mean(h1, axis=-1, keepdims=True)
    var1 = jnp.mean((h1 - mu1) ** 2, axis=-1, keepdims=True)
    out1 = (h1 - mu1) * jax.lax.rsqrt(var1 + 1e-5) * g1_ref[...] + beta1_ref[...]

    # --- FeedForward: bf16 MXU operands, f32 elementwise ---
    # TODO(synk): at production dff, stream w1/w2 over dff slabs (grid axis or
    #             emit_pipeline) to fit v7x's 64 MiB VMEM.
    ff = jnp.dot(out1.astype(jnp.bfloat16), w1_ref[...],
                 preferred_element_type=jnp.float32) + b1_ref[...]
    ff = jnp.maximum(ff, 0.0)
    ff = jnp.dot(ff.astype(jnp.bfloat16), w2_ref[...],
                 preferred_element_type=jnp.float32) + b2_ref[...]

    # dropout2: identity (eval mode)
    h2 = out1 + ff
    mu2 = jnp.mean(h2, axis=-1, keepdims=True)
    var2 = jnp.mean((h2 - mu2) ** 2, axis=-1, keepdims=True)
    out2 = (h2 - mu2) * jax.lax.rsqrt(var2 + 1e-5) * g2_ref[...] + beta2_ref[...]
    out_ref[...] = out2.astype(out_ref.dtype)


def prepare_encoder_params(params):
    """One-time dtype preparation (hoisted out of the per-call path per review):
    weight matrices -> bf16 (MXU operands); biases / LayerNorm params -> f32."""
    bf, f32 = jnp.bfloat16, jnp.float32
    mats = ("wq", "wk", "wv", "wo", "w1", "w2")
    return {k: (v.astype(bf) if k in mats else v.astype(f32)) for k, v in params.items()}


def _pick_vmem_limit_bytes():
    # ~75% of physical VMEM: ~96 MiB on v5e/v6e (128 MiB), ~48 MiB on v7x (64 MiB).
    try:
        cap = int(pltpu.get_tpu_info().vmem_capacity_bytes)
    except Exception:
        cap = 64 * 1024 * 1024
    limit = (cap * 3) // 4
    return max(32 * 1024 * 1024, min(limit, 100 * 1024 * 1024))


def _const_index_map(ndim):
    return lambda b, n=ndim: (0,) * n


def _build_encoder_call(B, S, D, dff, num_heads, *, single_buffer_weights):
    bf = jnp.bfloat16

    def weight_spec(shape):
        if single_buffer_weights:
            # Invariant across the batch grid: single-buffer to halve weight VMEM.
            return pl.BlockSpec(shape, _const_index_map(len(shape)),
                                pipeline_mode=pl.Buffered(1))
        return pl.BlockSpec(shape, _const_index_map(len(shape)))

    def small_spec(shape):
        return pl.BlockSpec(shape, _const_index_map(len(shape)))

    in_specs = [
        pl.BlockSpec((S, D), lambda b: (b, 0)),              # x (one sequence per step)
        weight_spec((D, D)), small_spec((1, D)),             # wq, bq
        weight_spec((D, D)), small_spec((1, D)),             # wk, bk
        weight_spec((D, D)), small_spec((1, D)),             # wv, bv
        weight_spec((D, D)), small_spec((1, D)),             # wo, bo
        weight_spec((D, dff)), small_spec((1, dff)),         # w1, b1
        weight_spec((dff, D)), small_spec((1, D)),           # w2, b2
        small_spec((1, D)), small_spec((1, D)),              # g1, beta1
        small_spec((1, D)), small_spec((1, D)),              # g2, beta2
    ]

    kernel = functools.partial(encoder_layer_kernel, num_heads=num_heads)

    BS = B * S
    # Advisory scheduling hint for XLA.
    flops = 8 * BS * D * D + 4 * B * S * S * D + 4 * BS * D * dff
    transcendentals = (B * num_heads * S * S       # exp
                       + B * num_heads * S         # reciprocal
                       + 2 * BS)                   # rsqrt
    bytes_accessed = (2 * 2 * BS * D                       # x in + out (bf16)
                      + 2 * (4 * D * D + 2 * D * dff)      # bf16 weights
                      + 4 * (9 * D + dff))                 # f32 biases + LN params

    return pl.pallas_call(
        kernel,
        out_shape=jax.ShapeDtypeStruct((BS, D), bf),
        grid_spec=pltpu.PrefetchScalarGridSpec(
            num_scalar_prefetch=0,
            grid=(B,),
            in_specs=in_specs,
            out_specs=pl.BlockSpec((S, D), lambda b: (b, 0)),
        ),
        compiler_params=pltpu.CompilerParams(
            dimension_semantics=("parallel",),     # batches are independent (megacore)
            vmem_limit_bytes=_pick_vmem_limit_bytes(),
        ),
        cost_estimate=pl.CostEstimate(
            flops=flops,
            transcendentals=transcendentals,
            bytes_accessed=bytes_accessed,
        ),
    )


def encoder_layer(x, params, *, num_heads):
    """x: (B, S, D) float.  params: prepared dict (weights bf16, stored as torch W.T)."""
    B, S, D = x.shape
    dff = params["w1"].shape[1]

    # bf16 HBM interface for activations; f32 math happens inside the kernel.
    x_bf = x.reshape(B * S, D).astype(jnp.bfloat16)

    args = (x_bf,
            params["wq"], params["bq"], params["wk"], params["bk"],
            params["wv"], params["bv"], params["wo"], params["bo"],
            params["w1"], params["b1"], params["w2"], params["b2"],
            params["g1"], params["beta1"], params["g2"], params["beta2"])

    try:
        out2 = _build_encoder_call(B, S, D, dff, num_heads,
                                   single_buffer_weights=True)(*args)
    except Exception:
        # TODO(synk): fallback for JAX versions without pl.Buffered pipeline_mode.
        out2 = _build_encoder_call(B, S, D, dff, num_heads,
                                   single_buffer_weights=False)(*args)
    return out2.reshape(B, S, D)


def reference_encoder_layer(x, params, *, num_heads):
    """Pure-JAX f32 reference with the module's semantics (for correctness check)."""
    B, S, D = x.shape
    depth = D // num_heads

    def ln(h, g, b):
        mu = jnp.mean(h, -1, keepdims=True)
        var = jnp.mean((h - mu) ** 2, -1, keepdims=True)
        return (h - mu) * jax.lax.rsqrt(var + 1e-5) * g + b

    q = x @ params["wq"] + params["bq"]
    k = x @ params["wk"] + params["bk"]
    v = x @ params["wv"] + params["bv"]

    def split(t):
        return t.reshape(B, S, num_heads, depth).transpose(0, 2, 1, 3)

    qh, kh, vh = split(q), split(k), split(v)
    logits = jnp.einsum("bhqd,bhkd->bhqk", qh, kh) / math.sqrt(depth)
    attn = jax.nn.softmax(logits, axis=-1)
    o = jnp.einsum("bhqk,bhkd->bhqd", attn, vh)
    o = o.transpose(0, 2, 1, 3).reshape(B, S, D)
    attn_out = o @ params["wo"] + params["bo"]
    out1 = ln(x + attn_out, params["g1"], params["beta1"])
    ff = jnp.maximum(out1 @ params["w1"] + params["b1"], 0.0) @ params["w2"] + params["b2"]
    return ln(out1 + ff, params["g2"], params["beta2"])


if __name__ == "__main__":
    B, S, D, H, DFF = 2, 8, 32, 4, 64

    key = jax.random.PRNGKey(0)
    ks = jax.random.split(key, 16)

    def init(k, shape, scale=0.1):
        return (scale * jax.random.normal(k, shape)).astype(jnp.float32)

    params_f32 = {
        # Linear weights stored as (in, out), i.e. torch W.T
        "wq": init(ks[0], (D, D)), "bq": init(ks[1], (1, D)),
        "wk": init(ks[2], (D, D)), "bk": init(ks[3], (1, D)),
        "wv": init(ks[4], (D, D)), "bv": init(ks[5], (1, D)),
        "wo": init(ks[6], (D, D)), "bo": init(ks[7], (1, D)),
        "w1": init(ks[8], (D, DFF)), "b1": init(ks[9], (1, DFF)),
        "w2": init(ks[10], (DFF, D)), "b2": init(ks[11], (1, D)),
        # LayerNorm params (torch default init: gamma=1, beta=0)
        "g1": jnp.ones((1, D), jnp.float32), "beta1": jnp.zeros((1, D), jnp.float32),
        "g2": jnp.ones((1, D), jnp.float32), "beta2": jnp.zeros((1, D), jnp.float32),
    }

    x = init(ks[12], (B, S, D), scale=1.0)

    # One-time weight dtype preparation (hoisted out of the per-call path).
    params = prepare_encoder_params(params_f32)

    out = encoder_layer(x, params, num_heads=H)
    out = jax.block_until_ready(out)

    ref = reference_encoder_layer(x, params_f32, num_heads=H)
    assert out.shape == (B, S, D)
    out_f32 = out.astype(jnp.float32)
    max_err = float(jnp.max(jnp.abs(out_f32 - ref)))
    # bf16 MXU operands + bf16 activation HBM interface -> relaxed tolerance vs f32 ref.
    assert jnp.allclose(out_f32, ref, atol=5e-2, rtol=5e-2), (
        f"mismatch vs reference (max abs err {max_err})")

    print("KERNEL_OK")
</pallas_src>

<mosaic_0001>
module attributes {stable_mosaic.version = 11 : i64} {
  func.func @encoder_layer_kernel(%arg0: i32, %arg1: memref<8x32xbf16, #tpu.memory_space<vmem>>, %arg2: memref<32x32xbf16, #tpu.memory_space<vmem>>, %arg3: memref<1x32xf32, #tpu.memory_space<vmem>>, %arg4: memref<32x32xbf16, #tpu.memory_space<vmem>>, %arg5: memref<1x32xf32, #tpu.memory_space<vmem>>, %arg6: memref<32x32xbf16, #tpu.memory_space<vmem>>, %arg7: memref<1x32xf32, #tpu.memory_space<vmem>>, %arg8: memref<32x32xbf16, #tpu.memory_space<vmem>>, %arg9: memref<1x32xf32, #tpu.memory_space<vmem>>, %arg10: memref<32x64xbf16, #tpu.memory_space<vmem>>, %arg11: memref<1x64xf32, #tpu.memory_space<vmem>>, %arg12: memref<64x32xbf16, #tpu.memory_space<vmem>>, %arg13: memref<1x32xf32, #tpu.memory_space<vmem>>, %arg14: memref<1x32xf32, #tpu.memory_space<vmem>>, %arg15: memref<1x32xf32, #tpu.memory_space<vmem>>, %arg16: memref<1x32xf32, #tpu.memory_space<vmem>>, %arg17: memref<1x32xf32, #tpu.memory_space<vmem>>, %arg18: memref<8x32xbf16, #tpu.memory_space<vmem>>) attributes {dimension_semantics = [#tpu.dimension_semantics<parallel>], iteration_bounds = array<i64: 2>, scalar_prefetch = 0 : i64, scratch_operands = 0 : i64, tpu.core_type = #tpu.core_type<tc>, window_params = [{transform_indices = @transform_0, window_bounds = array<i64: 8, 32>}, {pipeline_mode = #tpu.pipeline_mode<synchronous>, transform_indices = @transform_1, window_bounds = array<i64: 32, 32>}, {pipeline_mode = #tpu.pipeline_mode<synchronous>, transform_indices = @transform_2, window_bounds = array<i64: 1, 32>}, {pipeline_mode = #tpu.pipeline_mode<synchronous>, transform_indices = @transform_3, window_bounds = array<i64: 32, 32>}, {pipeline_mode = #tpu.pipeline_mode<synchronous>, transform_indices = @transform_4, window_bounds = array<i64: 1, 32>}, {pipeline_mode = #tpu.pipeline_mode<synchronous>, transform_indices = @transform_5, window_bounds = array<i64: 32, 32>}, {pipeline_mode = #tpu.pipeline_mode<synchronous>, transform_indices = @transform_6, window_bounds = array<i64: 1, 32>}, {pipeline_mode = #tpu.pipeline_mode<synchronous>, transform_indices = @transform_7, window_bounds = array<i64: 32, 32>}, {pipeline_mode = #tpu.pipeline_mode<synchronous>, transform_indices = @transform_8, window_bounds = array<i64: 1, 32>}, {pipeline_mode = #tpu.pipeline_mode<synchronous>, transform_indices = @transform_9, window_bounds = array<i64: 32, 64>}, {pipeline_mode = #tpu.pipeline_mode<synchronous>, transform_indices = @transform_10, window_bounds = array<i64: 1, 64>}, {pipeline_mode = #tpu.pipeline_mode<synchronous>, transform_indices = @transform_11, window_bounds = array<i64: 64, 32>}, {pipeline_mode = #tpu.pipeline_mode<synchronous>, transform_indices = @transform_12, window_bounds = array<i64: 1, 32>}, {pipeline_mode = #tpu.pipeline_mode<synchronous>, transform_indices = @transform_13, window_bounds = array<i64: 1, 32>}, {pipeline_mode = #tpu.pipeline_mode<synchronous>, transform_indices = @transform_14, window_bounds = array<i64: 1, 32>}, {pipeline_mode = #tpu.pipeline_mode<synchronous>, transform_indices = @transform_15, window_bounds = array<i64: 1, 32>}, {pipeline_mode = #tpu.pipeline_mode<synchronous>, transform_indices = @transform_16, window_bounds = array<i64: 1, 32>}, {transform_indices = @transform_17, window_bounds = array<i64: 8, 32>}]} {
    %c0 = arith.constant 0 : index
    %c0_0 = arith.constant 0 : index
    %0 = vector.load %arg1[%c0, %c0_0] : memref<8x32xbf16, #tpu.memory_space<vmem>>, vector<8x32xbf16>
    %1 = arith.extf %0 : vector<8x32xbf16> to vector<8x32xf32>
    %c0_1 = arith.constant 0 : index
    %c0_2 = arith.constant 0 : index
    %2 = vector.load %arg2[%c0_1, %c0_2] : memref<32x32xbf16, #tpu.memory_space<vmem>>, vector<32x32xbf16>
    %cst = arith.constant dense<0.000000e+00> : vector<8x32xf32>
    %3 = tpu.matmul %0, %2, %cst {dimension_numbers = #tpu.dot_dimension_numbers<[1], [0], [0], [1], [0, 0, 1, 1], [], []>} : vector<8x32xbf16>, vector<32x32xbf16>, vector<8x32xf32> -> vector<8x32xf32>
    %c0_3 = arith.constant 0 : index
    %c0_4 = arith.constant 0 : index
    %4 = vector.load %arg3[%c0_3, %c0_4] : memref<1x32xf32, #tpu.memory_space<vmem>>, vector<1x32xf32>
    %5 = vector.broadcast %4 : vector<1x32xf32> to vector<8x32xf32>
    %6 = arith.addf %3, %5 : vector<8x32xf32>
    %c0_5 = arith.constant 0 : index
    %c0_6 = arith.constant 0 : index
    %7 = vector.load %arg4[%c0_5, %c0_6] : memref<32x32xbf16, #tpu.memory_space<vmem>>, vector<32x32xbf16>
    %cst_7 = arith.constant dense<0.000000e+00> : vector<8x32xf32>
    %8 = tpu.matmul %0, %7, %cst_7 {dimension_numbers = #tpu.dot_dimension_numbers<[1], [0], [0], [1], [0, 0, 1, 1], [], []>} : vector<8x32xbf16>, vector<32x32xbf16>, vector<8x32xf32> -> vector<8x32xf32>
    %c0_8 = arith.constant 0 : index
    %c0_9 = arith.constant 0 : index
    %9 = vector.load %arg5[%c0_8, %c0_9] : memref<1x32xf32, #tpu.memory_space<vmem>>, vector<1x32xf32>
    %10 = vector.broadcast %9 : vector<1x32xf32> to vector<8x32xf32>
    %11 = arith.addf %8, %10 : vector<8x32xf32>
    %c0_10 = arith.constant 0 : index
    %c0_11 = arith.constant 0 : index
    %12 = vector.load %arg6[%c0_10, %c0_11] : memref<32x32xbf16, #tpu.memory_space<vmem>>, vector<32x32xbf16>
    %cst_12 = arith.constant dense<0.000000e+00> : vector<8x32xf32>
    %13 = tpu.matmul %0, %12, %cst_12 {dimension_numbers = #tpu.dot_dimension_numbers<[1], [0], [0], [1], [0, 0, 1, 1], [], []>} : vector<8x32xbf16>, vector<32x32xbf16>, vector<8x32xf32> -> vector<8x32xf32>
    %c0_13 = arith.constant 0 : index
    %c0_14 = arith.constant 0 : index
    %14 = vector.load %arg7[%c0_13, %c0_14] : memref<1x32xf32, #tpu.memory_space<vmem>>, vector<1x32xf32>
    %15 = vector.broadcast %14 : vector<1x32xf32> to vector<8x32xf32>
    %16 = arith.addf %13, %15 : vector<8x32xf32>
    %17 = arith.truncf %6 : vector<8x32xf32> to vector<8x32xbf16>
    %18 = arith.truncf %11 : vector<8x32xf32> to vector<8x32xbf16>
    %19 = arith.truncf %16 : vector<8x32xf32> to vector<8x32xbf16>
    %c0_15 = arith.constant 0 : index
    %c0_16 = arith.constant 0 : index
    %20 = vector.load %arg8[%c0_15, %c0_16] : memref<32x32xbf16, #tpu.memory_space<vmem>>, vector<32x32xbf16>
    %cst_17 = arith.constant 0.000000e+00 : f32
    %21 = vector.broadcast %cst_17 : f32 to vector<8x32xf32>
    %22 = vector.extract_strided_slice %17 {offsets = [0, 0], sizes = [8, 8], strides = [1, 1]} : vector<8x32xbf16> to vector<8x8xbf16>
    %23 = vector.extract_strided_slice %18 {offsets = [0, 0], sizes = [8, 8], strides = [1, 1]} : vector<8x32xbf16> to vector<8x8xbf16>
    %24 = vector.extract_strided_slice %19 {offsets = [0, 0], sizes = [8, 8], strides = [1, 1]} : vector<8x32xbf16> to vector<8x8xbf16>
    %cst_18 = arith.constant dense<0.000000e+00> : vector<8x8xf32>
    %25 = tpu.matmul %22, %23, %cst_18 {dimension_numbers = #tpu.dot_dimension_numbers<[1], [1], [0], [0], [0, 0, 1, 0], [], []>} : vector<8x8xbf16>, vector<8x8xbf16>, vector<8x8xf32> -> vector<8x8xf32>
    %cst_19 = arith.constant 0.353553385 : f32
    %26 = vector.broadcast %cst_19 : f32 to vector<8x8xf32>
    %27 = arith.mulf %25, %26 : vector<8x8xf32>
    %cst_20 = arith.constant dense<0xFF800000> : vector<8xf32>
    %28 = vector.multi_reduction <maximumf>, %27, %cst_20 [1] : vector<8x8xf32> to vector<8xf32>
    %29 = vector.shape_cast %28 : vector<8xf32> to vector<8x1xf32>
    %30 = vector.broadcast %29 : vector<8x1xf32> to vector<8x8xf32>
    %31 = arith.subf %27, %30 : vector<8x8xf32>
    %32 = math.exp %31 : vector<8x8xf32>
    %cst_21 = arith.constant dense<0.000000e+00> : vector<8xf32>
    %33 = vector.multi_reduction <add>, %32, %cst_21 [1] : vector<8x8xf32> to vector<8xf32>
    %34 = vector.shape_cast %33 : vector<8xf32> to vector<8x1xf32>
    %35 = tpu.reciprocal %34 {approx = true} : vector<8x1xf32> -> vector<8x1xf32>
    %36 = vector.broadcast %35 : vector<8x1xf32> to vector<8x8xf32>
    %37 = arith.mulf %32, %36 : vector<8x8xf32>
    %38 = arith.truncf %37 : vector<8x8xf32> to vector<8x8xbf16>
    %cst_22 = arith.constant dense<0.000000e+00> : vector<8x8xf32>
    %39 = tpu.matmul %38, %24, %cst_22 {dimension_numbers = #tpu.dot_dimension_numbers<[1], [0], [0], [1], [0, 0, 1, 1], [], []>} : vector<8x8xbf16>, vector<8x8xbf16>, vector<8x8xf32> -> vector<8x8xf32>
    %40 = arith.truncf %39 : vector<8x8xf32> to vector<8x8xbf16>
    %41 = vector.extract_strided_slice %20 {offsets = [0, 0], sizes = [8, 32], strides = [1, 1]} : vector<32x32xbf16> to vector<8x32xbf16>
    %cst_23 = arith.constant dense<0.000000e+00> : vector<8x32xf32>
    %42 = tpu.matmul %40, %41, %cst_23 {dimension_numbers = #tpu.dot_dimension_numbers<[1], [0], [0], [1], [0, 0, 1, 1], [], []>} : vector<8x8xbf16>, vector<8x32xbf16>, vector<8x32xf32> -> vector<8x32xf32>
    %43 = arith.addf %21, %42 : vector<8x32xf32>
    %44 = vector.extract_strided_slice %17 {offsets = [0, 8], sizes = [8, 8], strides = [1, 1]} : vector<8x32xbf16> to vector<8x8xbf16>
    %45 = vector.extract_strided_slice %18 {offsets = [0, 8], sizes = [8, 8], strides = [1, 1]} : vector<8x32xbf16> to vector<8x8xbf16>
    %46 = vector.extract_strided_slice %19 {offsets = [0, 8], sizes = [8, 8], strides = [1, 1]} : vector<8x32xbf16> to vector<8x8xbf16>
    %cst_24 = arith.constant dense<0.000000e+00> : vector<8x8xf32>
    %47 = tpu.matmul %44, %45, %cst_24 {dimension_numbers = #tpu.dot_dimension_numbers<[1], [1], [0], [0], [0, 0, 1, 0], [], []>} : vector<8x8xbf16>, vector<8x8xbf16>, vector<8x8xf32> -> vector<8x8xf32>
    %cst_25 = arith.constant 0.353553385 : f32
    %48 = vector.broadcast %cst_25 : f32 to vector<8x8xf32>
    %49 = arith.mulf %47, %48 : vector<8x8xf32>
    %cst_26 = arith.constant dense<0xFF800000> : vector<8xf32>
    %50 = vector.multi_reduction <maximumf>, %49, %cst_26 [1] : vector<8x8xf32> to vector<8xf32>
    %51 = vector.shape_cast %50 : vector<8xf32> to vector<8x1xf32>
    %52 = vector.broadcast %51 : vector<8x1xf32> to vector<8x8xf32>
    %53 = arith.subf %49, %52 : vector<8x8xf32>
    %54 = math.exp %53 : vector<8x8xf32>
    %cst_27 = arith.constant dense<0.000000e+00> : vector<8xf32>
    %55 = vector.multi_reduction <add>, %54, %cst_27 [1] : vector<8x8xf32> to vector<8xf32>
    %56 = vector.shape_cast %55 : vector<8xf32> to vector<8x1xf32>
    %57 = tpu.reciprocal %56 {approx = true} : vector<8x1xf32> -> vector<8x1xf32>
    %58 = vector.broadcast %57 : vector<8x1xf32> to vector<8x8xf32>
    %59 = arith.mulf %54, %58 : vector<8x8xf32>
    %60 = arith.truncf %59 : vector<8x8xf32> to vector<8x8xbf16>
    %cst_28 = arith.constant dense<0.000000e+00> : vector<8x8xf32>
    %61 = tpu.matmul %60, %46, %cst_28 {dimension_numbers = #tpu.dot_dimension_numbers<[1], [0], [0], [1], [0, 0, 1, 1], [], []>} : vector<8x8xbf16>, vector<8x8xbf16>, vector<8x8xf32> -> vector<8x8xf32>
    %62 = arith.truncf %61 : vector<8x8xf32> to vector<8x8xbf16>
    %63 = vector.extract_strided_slice %20 {offsets = [8, 0], sizes = [8, 32], strides = [1, 1]} : vector<32x32xbf16> to vector<8x32xbf16>
    %cst_29 = arith.constant dense<0.000000e+00> : vector<8x32xf32>
    %64 = tpu.matmul %62, %63, %cst_29 {dimension_numbers = #tpu.dot_dimension_numbers<[1], [0], [0], [1], [0, 0, 1, 1], [], []>} : vector<8x8xbf16>, vector<8x32xbf16>, vector<8x32xf32> -> vector<8x32xf32>
    %65 = arith.addf %43, %64 : vector<8x32xf32>
    %66 = vector.extract_strided_slice %17 {offsets = [0, 16], sizes = [8, 8], strides = [1, 1]} : vector<8x32xbf16> to vector<8x8xbf16>
    %67 = vector.extract_strided_slice %18 {offsets = [0, 16], sizes = [8, 8], strides = [1, 1]} : vector<8x32xbf16> to vector<8x8xbf16>
    %68 = vector.extract_strided_slice %19 {offsets = [0, 16], sizes = [8, 8], strides = [1, 1]} : vector<8x32xbf16> to vector<8x8xbf16>
    %cst_30 = arith.constant dense<0.000000e+00> : vector<8x8xf32>
    %69 = tpu.matmul %66, %67, %cst_30 {dimension_numbers = #tpu.dot_dimension_numbers<[1], [1], [0], [0], [0, 0, 1, 0], [], []>} : vector<8x8xbf16>, vector<8x8xbf16>, vector<8x8xf32> -> vector<8x8xf32>
    %cst_31 = arith.constant 0.353553385 : f32
    %70 = vector.broadcast %cst_31 : f32 to vector<8x8xf32>
    %71 = arith.mulf %69, %70 : vector<8x8xf32>
    %cst_32 = arith.constant dense<0xFF800000> : vector<8xf32>
    %72 = vector.multi_reduction <maximumf>, %71, %cst_32 [1] : vector<8x8xf32> to vector<8xf32>
    %73 = vector.shape_cast %72 : vector<8xf32> to vector<8x1xf32>
    %74 = vector.broadcast %73 : vector<8x1xf32> to vector<8x8xf32>
    %75 = arith.subf %71, %74 : vector<8x8xf32>
    %76 = math.exp %75 : vector<8x8xf32>
    %cst_33 = arith.constant dense<0.000000e+00> : vector<8xf32>
    %77 = vector.multi_reduction <add>, %76, %cst_33 [1] : vector<8x8xf32> to vector<8xf32>
    %78 = vector.shape_cast %77 : vector<8xf32> to vector<8x1xf32>
    %79 = tpu.reciprocal %78 {approx = true} : vector<8x1xf32> -> vector<8x1xf32>
    %80 = vector.broadcast %79 : vector<8x1xf32> to vector<8x8xf32>
    %81 = arith.mulf %76, %80 : vector<8x8xf32>
    %82 = arith.truncf %81 : vector<8x8xf32> to vector<8x8xbf16>
    %cst_34 = arith.constant dense<0.000000e+00> : vector<8x8xf32>
    %83 = tpu.matmul %82, %68, %cst_34 {dimension_numbers = #tpu.dot_dimension_numbers<[1], [0], [0], [1], [0, 0, 1, 1], [], []>} : vector<8x8xbf16>, vector<8x8xbf16>, vector<8x8xf32> -> vector<8x8xf32>
    %84 = arith.truncf %83 : vector<8x8xf32> to vector<8x8xbf16>
    %85 = vector.extract_strided_slice %20 {offsets = [16, 0], sizes = [8, 32], strides = [1, 1]} : vector<32x32xbf16> to vector<8x32xbf16>
    %cst_35 = arith.constant dense<0.000000e+00> : vector<8x32xf32>
    %86 = tpu.matmul %84, %85, %cst_35 {dimension_numbers = #tpu.dot_dimension_numbers<[1], [0], [0], [1], [0, 0, 1, 1], [], []>} : vector<8x8xbf16>, vector<8x32xbf16>, vector<8x32xf32> -> vector<8x32xf32>
    %87 = arith.addf %65, %86 : vector<8x32xf32>
    %88 = vector.extract_strided_slice %17 {offsets = [0, 24], sizes = [8, 8], strides = [1, 1]} : vector<8x32xbf16> to vector<8x8xbf16>
    %89 = vector.extract_strided_slice %18 {offsets = [0, 24], sizes = [8, 8], strides = [1, 1]} : vector<8x32xbf16> to vector<8x8xbf16>
    %90 = vector.extract_strided_slice %19 {offsets = [0, 24], sizes = [8, 8], strides = [1, 1]} : vector<8x32xbf16> to vector<8x8xbf16>
    %cst_36 = arith.constant dense<0.000000e+00> : vector<8x8xf32>
    %91 = tpu.matmul %88, %89, %cst_36 {dimension_numbers = #tpu.dot_dimension_numbers<[1], [1], [0], [0], [0, 0, 1, 0], [], []>} : vector<8x8xbf16>, vector<8x8xbf16>, vector<8x8xf32> -> vector<8x8xf32>
    %cst_37 = arith.constant 0.353553385 : f32
    %92 = vector.broadcast %cst_37 : f32 to vector<8x8xf32>
    %93 = arith.mulf %91, %92 : vector<8x8xf32>
    %cst_38 = arith.constant dense<0xFF800000> : vector<8xf32>
    %94 = vector.multi_reduction <maximumf>, %93, %cst_38 [1] : vector<8x8xf32> to vector<8xf32>
    %95 = vector.shape_cast %94 : vector<8xf32> to vector<8x1xf32>
    %96 = vector.broadcast %95 : vector<8x1xf32> to vector<8x8xf32>
    %97 = arith.subf %93, %96 : vector<8x8xf32>
    %98 = math.exp %97 : vector<8x8xf32>
    %cst_39 = arith.constant dense<0.000000e+00> : vector<8xf32>
    %99 = vector.multi_reduction <add>, %98, %cst_39 [1] : vector<8x8xf32> to vector<8xf32>
    %100 = vector.shape_cast %99 : vector<8xf32> to vector<8x1xf32>
    %101 = tpu.reciprocal %100 {approx = true} : vector<8x1xf32> -> vector<8x1xf32>
    %102 = vector.broadcast %101 : vector<8x1xf32> to vector<8x8xf32>
    %103 = arith.mulf %98, %102 : vector<8x8xf32>
    %104 = arith.truncf %103 : vector<8x8xf32> to vector<8x8xbf16>
    %cst_40 = arith.constant dense<0.000000e+00> : vector<8x8xf32>
    %105 = tpu.matmul %104, %90, %cst_40 {dimension_numbers = #tpu.dot_dimension_numbers<[1], [0], [0], [1], [0, 0, 1, 1], [], []>} : vector<8x8xbf16>, vector<8x8xbf16>, vector<8x8xf32> -> vector<8x8xf32>
    %106 = arith.truncf %105 : vector<8x8xf32> to vector<8x8xbf16>
    %107 = vector.extract_strided_slice %20 {offsets = [24, 0], sizes = [8, 32], strides = [1, 1]} : vector<32x32xbf16> to vector<8x32xbf16>
    %cst_41 = arith.constant dense<0.000000e+00> : vector<8x32xf32>
    %108 = tpu.matmul %106, %107, %cst_41 {dimension_numbers = #tpu.dot_dimension_numbers<[1], [0], [0], [1], [0, 0, 1, 1], [], []>} : vector<8x8xbf16>, vector<8x32xbf16>, vector<8x32xf32> -> vector<8x32xf32>
    %109 = arith.addf %87, %108 : vector<8x32xf32>
    %c0_42 = arith.constant 0 : index
    %c0_43 = arith.constant 0 : index
    %110 = vector.load %arg9[%c0_42, %c0_43] : memref<1x32xf32, #tpu.memory_space<vmem>>, vector<1x32xf32>
    %111 = vector.broadcast %110 : vector<1x32xf32> to vector<8x32xf32>
    %112 = arith.addf %109, %111 : vector<8x32xf32>
    %113 = arith.addf %1, %112 : vector<8x32xf32>
    %cst_44 = arith.constant dense<0.000000e+00> : vector<8xf32>
    %114 = vector.multi_reduction <add>, %113, %cst_44 [1] : vector<8x32xf32> to vector<8xf32>
    %115 = vector.shape_cast %114 : vector<8xf32> to vector<8x1xf32>
    %cst_45 = arith.constant 3.200000e+01 : f32
    %116 = vector.broadcast %cst_45 : f32 to vector<8x1xf32>
    %117 = arith.divf %115, %116 : vector<8x1xf32>
    %118 = vector.broadcast %117 : vector<8x1xf32> to vector<8x32xf32>
    %119 = arith.subf %113, %118 : vector<8x32xf32>
    %120 = arith.mulf %119, %119 : vector<8x32xf32>
    %cst_46 = arith.constant dense<0.000000e+00> : vector<8xf32>
    %121 = vector.multi_reduction <add>, %120, %cst_46 [1] : vector<8x32xf32> to vector<8xf32>
    %122 = vector.shape_cast %121 : vector<8xf32> to vector<8x1xf32>
    %cst_47 = arith.constant 3.200000e+01 : f32
    %123 = vector.broadcast %cst_47 : f32 to vector<8x1xf32>
    %124 = arith.divf %122, %123 : vector<8x1xf32>
    %125 = vector.broadcast %117 : vector<8x1xf32> to vector<8x32xf32>
    %126 = arith.subf %113, %125 : vector<8x32xf32>
    %cst_48 = arith.constant 9.99999974E-6 : f32
    %127 = vector.broadcast %cst_48 : f32 to vector<8x1xf32>
    %128 = arith.addf %124, %127 : vector<8x1xf32>
    %129 = math.rsqrt %128 : vector<8x1xf32>
    %130 = vector.broadcast %129 : vector<8x1xf32> to vector<8x32xf32>
    %131 = arith.mulf %126, %130 : vector<8x32xf32>
    %c0_49 = arith.constant 0 : index
    %c0_50 = arith.constant 0 : index
    %132 = vector.load %arg14[%c0_49, %c0_50] : memref<1x32xf32, #tpu.memory_space<vmem>>, vector<1x32xf32>
    %133 = vector.broadcast %132 : vector<1x32xf32> to vector<8x32xf32>
    %134 = arith.mulf %131, %133 : vector<8x32xf32>
    %c0_51 = arith.constant 0 : index
    %c0_52 = arith.constant 0 : index
    %135 = vector.load %arg15[%c0_51, %c0_52] : memref<1x32xf32, #tpu.memory_space<vmem>>, vector<1x32xf32>
    %136 = vector.broadcast %135 : vector<1x32xf32> to vector<8x32xf32>
    %137 = arith.addf %134, %136 : vector<8x32xf32>
    %138 = arith.truncf %137 : vector<8x32xf32> to vector<8x32xbf16>
    %c0_53 = arith.constant 0 : index
    %c0_54 = arith.constant 0 : index
    %139 = vector.load %arg10[%c0_53, %c0_54] : memref<32x64xbf16, #tpu.memory_space<vmem>>, vector<32x64xbf16>
    %cst_55 = arith.constant dense<0.000000e+00> : vector<8x64xf32>
    %140 = tpu.matmul %138, %139, %cst_55 {dimension_numbers = #tpu.dot_dimension_numbers<[1], [0], [0], [1], [0, 0, 1, 1], [], []>} : vector<8x32xbf16>, vector<32x64xbf16>, vector<8x64xf32> -> vector<8x64xf32>
    %c0_56 = arith.constant 0 : index
    %c0_57 = arith.constant 0 : index
    %141 = vector.load %arg11[%c0_56, %c0_57] : memref<1x64xf32, #tpu.memory_space<vmem>>, vector<1x64xf32>
    %142 = vector.broadcast %141 : vector<1x64xf32> to vector<8x64xf32>
    %143 = arith.addf %140, %142 : vector<8x64xf32>
    %cst_58 = arith.constant 0.000000e+00 : f32
    %144 = vector.broadcast %cst_58 : f32 to vector<8x64xf32>
    %145 = arith.maximumf %143, %144 : vector<8x64xf32>
    %146 = arith.truncf %145 : vector<8x64xf32> to vector<8x64xbf16>
    %c0_59 = arith.constant 0 : index
    %c0_60 = arith.constant 0 : index
    %147 = vector.load %arg12[%c0_59, %c0_60] : memref<64x32xbf16, #tpu.memory_space<vmem>>, vector<64x32xbf16>
    %cst_61 = arith.constant dense<0.000000e+00> : vector<8x32xf32>
    %148 = tpu.matmul %146, %147, %cst_61 {dimension_numbers = #tpu.dot_dimension_numbers<[1], [0], [0], [1], [0, 0, 1, 1], [], []>} : vector<8x64xbf16>, vector<64x32xbf16>, vector<8x32xf32> -> vector<8x32xf32>
    %c0_62 = arith.constant 0 : index
    %c0_63 = arith.constant 0 : index
    %149 = vector.load %arg13[%c0_62, %c0_63] : memref<1x32xf32, #tpu.memory_space<vmem>>, vector<1x32xf32>
    %150 = vector.broadcast %149 : vector<1x32xf32> to vector<8x32xf32>
    %151 = arith.addf %148, %150 : vector<8x32xf32>
    %152 = arith.addf %137, %151 : vector<8x32xf32>
    %cst_64 = arith.constant dense<0.000000e+00> : vector<8xf32>
    %153 = vector.multi_reduction <add>, %152, %cst_64 [1] : vector<8x32xf32> to vector<8xf32>
    %154 = vector.shape_cast %153 : vector<8xf32> to vector<8x1xf32>
    %cst_65 = arith.constant 3.200000e+01 : f32
    %155 = vector.broadcast %cst_65 : f32 to vector<8x1xf32>
    %156 = arith.divf %154, %155 : vector<8x1xf32>
    %157 = vector.broadcast %156 : vector<8x1xf32> to vector<8x32xf32>
    %158 = arith.subf %152, %157 : vector<8x32xf32>
    %159 = arith.mulf %158, %158 : vector<8x32xf32>
    %cst_66 = arith.constant dense<0.000000e+00> : vector<8xf32>
    %160 = vector.multi_reduction <add>, %159, %cst_66 [1] : vector<8x32xf32> to vector<8xf32>
    %161 = vector.shape_cast %160 : vector<8xf32> to vector<8x1xf32>
    %cst_67 = arith.constant 3.200000e+01 : f32
    %162 = vector.broadcast %cst_67 : f32 to vector<8x1xf32>
    %163 = arith.divf %161, %162 : vector<8x1xf32>
    %164 = vector.broadcast %156 : vector<8x1xf32> to vector<8x32xf32>
    %165 = arith.subf %152, %164 : vector<8x32xf32>
    %cst_68 = arith.constant 9.99999974E-6 : f32
    %166 = vector.broadcast %cst_68 : f32 to vector<8x1xf32>
    %167 = arith.addf %163, %166 : vector<8x1xf32>
    %168 = math.rsqrt %167 : vector<8x1xf32>
    %169 = vector.broadcast %168 : vector<8x1xf32> to vector<8x32xf32>
    %170 = arith.mulf %165, %169 : vector<8x32xf32>
    %c0_69 = arith.constant 0 : index
    %c0_70 = arith.constant 0 : index
    %171 = vector.load %arg16[%c0_69, %c0_70] : memref<1x32xf32, #tpu.memory_space<vmem>>, vector<1x32xf32>
    %172 = vector.broadcast %171 : vector<1x32xf32> to vector<8x32xf32>
    %173 = arith.mulf %170, %172 : vector<8x32xf32>
    %c0_71 = arith.constant 0 : index
    %c0_72 = arith.constant 0 : index
    %174 = vector.load %arg17[%c0_71, %c0_72] : memref<1x32xf32, #tpu.memory_space<vmem>>, vector<1x32xf32>
    %175 = vector.broadcast %174 : vector<1x32xf32> to vector<8x32xf32>
    %176 = arith.addf %173, %175 : vector<8x32xf32>
    %177 = arith.truncf %176 : vector<8x32xf32> to vector<8x32xbf16>
    %c0_73 = arith.constant 0 : index
    %c0_74 = arith.constant 0 : index
    %178 = vector.load %arg18[%c0_73, %c0_74] : memref<8x32xbf16, #tpu.memory_space<vmem>>, vector<8x32xbf16>
    tpu.vector_store %arg18[%c0_73, %c0_74], %177 {strides = array<i32>} : memref<8x32xbf16, #tpu.memory_space<vmem>>, vector<8x32xbf16>,
    return
  }
  func.func @transform_0(%arg0: i32) -> (i32, i32) {
    %c0_i32 = arith.constant 0 : i32
    %c0_i32_0 = arith.constant 0 : i32
    return %arg0, %c0_i32 : i32, i32
  }
  func.func @transform_1(%arg0: i32) -> (i32, i32) {
    %c0_i32 = arith.constant 0 : i32
    %c0_i32_0 = arith.constant 0 : i32
    %c0_i32_1 = arith.constant 0 : i32
    return %c0_i32, %c0_i32_0 : i32, i32
  }
  func.func @transform_2(%arg0: i32) -> (i32, i32) {
    %c0_i32 = arith.constant 0 : i32
    %c0_i32_0 = arith.constant 0 : i32
    %c0_i32_1 = arith.constant 0 : i32
    return %c0_i32, %c0_i32_0 : i32, i32
  }
  func.func @transform_3(%arg0: i32) -> (i32, i32) {
    %c0_i32 = arith.constant 0 : i32
    %c0_i32_0 = arith.constant 0 : i32
    %c0_i32_1 = arith.constant 0 : i32
    return %c0_i32, %c0_i32_0 : i32, i32
  }
  func.func @transform_4(%arg0: i32) -> (i32, i32) {
    %c0_i32 = arith.constant 0 : i32
    %c0_i32_0 = arith.constant 0 : i32
    %c0_i32_1 = arith.constant 0 : i32
    return %c0_i32, %c0_i32_0 : i32, i32
  }
  func.func @transform_5(%arg0: i32) -> (i32, i32) {
    %c0_i32 = arith.constant 0 : i32
    %c0_i32_0 = arith.constant 0 : i32
    %c0_i32_1 = arith.constant 0 : i32
    return %c0_i32, %c0_i32_0 : i32, i32
  }
  func.func @transform_6(%arg0: i32) -> (i32, i32) {
    %c0_i32 = arith.constant 0 : i32
    %c0_i32_0 = arith.constant 0 : i32
    %c0_i32_1 = arith.constant 0 : i32
    return %c0_i32, %c0_i32_0 : i32, i32
  }
  func.func @transform_7(%arg0: i32) -> (i32, i32) {
    %c0_i32 = arith.constant 0 : i32
    %c0_i32_0 = arith.constant 0 : i32
    %c0_i32_1 = arith.constant 0 : i32
    return %c0_i32, %c0_i32_0 : i32, i32
  }
  func.func @transform_8(%arg0: i32) -> (i32, i32) {
    %c0_i32 = arith.constant 0 : i32
    %c0_i32_0 = arith.constant 0 : i32
    %c0_i32_1 = arith.constant 0 : i32
    return %c0_i32, %c0_i32_0 : i32, i32
  }
  func.func @transform_9(%arg0: i32) -> (i32, i32) {
    %c0_i32 = arith.constant 0 : i32
    %c0_i32_0 = arith.constant 0 : i32
    %c0_i32_1 = arith.constant 0 : i32
    return %c0_i32, %c0_i32_0 : i32, i32
  }
  func.func @transform_10(%arg0: i32) -> (i32, i32) {
    %c0_i32 = arith.constant 0 : i32
    %c0_i32_0 = arith.constant 0 : i32
    %c0_i32_1 = arith.constant 0 : i32
    return %c0_i32, %c0_i32_0 : i32, i32
  }
  func.func @transform_11(%arg0: i32) -> (i32, i32) {
    %c0_i32 = arith.constant 0 : i32
    %c0_i32_0 = arith.constant 0 : i32
    %c0_i32_1 = arith.constant 0 : i32
    return %c0_i32, %c0_i32_0 : i32, i32
  }
  func.func @transform_12(%arg0: i32) -> (i32, i32) {
    %c0_i32 = arith.constant 0 : i32
    %c0_i32_0 = arith.constant 0 : i32
    %c0_i32_1 = arith.constant 0 : i32
    return %c0_i32, %c0_i32_0 : i32, i32
  }
  func.func @transform_13(%arg0: i32) -> (i32, i32) {
    %c0_i32 = arith.constant 0 : i32
    %c0_i32_0 = arith.constant 0 : i32
    %c0_i32_1 = arith.constant 0 : i32
    return %c0_i32, %c0_i32_0 : i32, i32
  }
  func.func @transform_14(%arg0: i32) -> (i32, i32) {
    %c0_i32 = arith.constant 0 : i32
    %c0_i32_0 = arith.constant 0 : i32
    %c0_i32_1 = arith.constant 0 : i32
    return %c0_i32, %c0_i32_0 : i32, i32
  }
  func.func @transform_15(%arg0: i32) -> (i32, i32) {
    %c0_i32 = arith.constant 0 : i32
    %c0_i32_0 = arith.constant 0 : i32
    %c0_i32_1 = arith.constant 0 : i32
    return %c0_i32, %c0_i32_0 : i32, i32
  }
  func.func @transform_16(%arg0: i32) -> (i32, i32) {
    %c0_i32 = arith.constant 0 : i32
    %c0_i32_0 = arith.constant 0 : i32
    %c0_i32_1 = arith.constant 0 : i32
    return %c0_i32, %c0_i32_0 : i32, i32
  }
  func.func @transform_17(%arg0: i32) -> (i32, i32) {
    %c0_i32 = arith.constant 0 : i32
    %c0_i32_0 = arith.constant 0 : i32
    return %arg0, %c0_i32 : i32, i32
  }
}

module attributes {stable_mosaic.version = 11 : i64} {
  func.func @encoder_layer_kernel(%arg0: i32, %arg1: memref<8x32xbf16, #tpu.memory_space<vmem>>, %arg2: memref<32x32xbf16, #tpu.memory_space<vmem>>, %arg3: memref<1x32xf32, #tpu.memory_space<vmem>>, %arg4: memref<32x32xbf16, #tpu.memory_space<vmem>>, %arg5: memref<1x32xf32, #tpu.memory_space<vmem>>, %arg6: memref<32x32xbf16, #tpu.memory_space<vmem>>, %arg7: memref<1x32xf32, #tpu.memory_space<vmem>>, %arg8: memref<32x32xbf16, #tpu.memory_space<vmem>>, %arg9: memref<1x32xf32, #tpu.memory_space<vmem>>, %arg10: memref<32x64xbf16, #tpu.memory_space<vmem>>, %arg11: memref<1x64xf32, #tpu.memory_space<vmem>>, %arg12: memref<64x32xbf16, #tpu.memory_space<vmem>>, %arg13: memref<1x32xf32, #tpu.memory_space<vmem>>, %arg14: memref<1x32xf32, #tpu.memory_space<vmem>>, %arg15: memref<1x32xf32, #tpu.memory_space<vmem>>, %arg16: memref<1x32xf32, #tpu.memory_space<vmem>>, %arg17: memref<1x32xf32, #tpu.memory_space<vmem>>, %arg18: memref<8x32xbf16, #tpu.memory_space<vmem>>) attributes {dimension_semantics = [#tpu.dimension_semantics<parallel>], iteration_bounds = array<i64: 2>, scalar_prefetch = 0 : i64, scratch_operands = 0 : i64, tpu.core_type = #tpu.core_type<tc>, window_params = [{transform_indices = @transform_0, window_bounds = array<i64: 8, 32>}, {pipeline_mode = #tpu.pipeline_mode<synchronous>, transform_indices = @transform_1, window_bounds = array<i64: 32, 32>}, {pipeline_mode = #tpu.pipeline_mode<synchronous>, transform_indices = @transform_2, window_bounds = array<i64: 1, 32>}, {pipeline_mode = #tpu.pipeline_mode<synchronous>, transform_indices = @transform_3, window_bounds = array<i64: 32, 32>}, {pipeline_mode = #tpu.pipeline_mode<synchronous>, transform_indices = @transform_4, window_bounds = array<i64: 1, 32>}, {pipeline_mode = #tpu.pipeline_mode<synchronous>, transform_indices = @transform_5, window_bounds = array<i64: 32, 32>}, {pipeline_mode = #tpu.pipeline_mode<synchronous>, transform_indices = @transform_6, window_bounds = array<i64: 1, 32>}, {pipeline_mode = #tpu.pipeline_mode<synchronous>, transform_indices = @transform_7, window_bounds = array<i64: 32, 32>}, {pipeline_mode = #tpu.pipeline_mode<synchronous>, transform_indices = @transform_8, window_bounds = array<i64: 1, 32>}, {pipeline_mode = #tpu.pipeline_mode<synchronous>, transform_indices = @transform_9, window_bounds = array<i64: 32, 64>}, {pipeline_mode = #tpu.pipeline_mode<synchronous>, transform_indices = @transform_10, window_bounds = array<i64: 1, 64>}, {pipeline_mode = #tpu.pipeline_mode<synchronous>, transform_indices = @transform_11, window_bounds = array<i64: 64, 32>}, {pipeline_mode = #tpu.pipeline_mode<synchronous>, transform_indices = @transform_12, window_bounds = array<i64: 1, 32>}, {pipeline_mode = #tpu.pipeline_mode<synchronous>, transform_indices = @transform_13, window_bounds = array<i64: 1, 32>}, {pipeline_mode = #tpu.pipeline_mode<synchronous>, transform_indices = @transform_14, window_bounds = array<i64: 1, 32>}, {pipeline_mode = #tpu.pipeline_mode<synchronous>, transform_indices = @transform_15, window_bounds = array<i64: 1, 32>}, {pipeline_mode = #tpu.pipeline_mode<synchronous>, transform_indices = @transform_16, window_bounds = array<i64: 1, 32>}, {transform_indices = @transform_17, window_bounds = array<i64: 8, 32>}]} {
    %c0 = arith.constant 0 : index
    %c0_0 = arith.constant 0 : index
    %0 = vector.load %arg1[%c0, %c0_0] : memref<8x32xbf16, #tpu.memory_space<vmem>>, vector<8x32xbf16>
    %1 = arith.extf %0 : vector<8x32xbf16> to vector<8x32xf32>
    %c0_1 = arith.constant 0 : index
    %c0_2 = arith.constant 0 : index
    %2 = vector.load %arg2[%c0_1, %c0_2] : memref<32x32xbf16, #tpu.memory_space<vmem>>, vector<32x32xbf16>
    %cst = arith.constant dense<0.000000e+00> : vector<8x32xf32>
    %3 = tpu.matmul %0, %2, %cst {dimension_numbers = #tpu.dot_dimension_numbers<[1], [0], [0], [1], [0, 0, 1, 1], [], []>} : vector<8x32xbf16>, vector<32x32xbf16>, vector<8x32xf32> -> vector<8x32xf32>
    %c0_3 = arith.constant 0 : index
    %c0_4 = arith.constant 0 : index
    %4 = vector.load %arg3[%c0_3, %c0_4] : memref<1x32xf32, #tpu.memory_space<vmem>>, vector<1x32xf32>
    %5 = vector.broadcast %4 : vector<1x32xf32> to vector<8x32xf32>
    %6 = arith.addf %3, %5 : vector<8x32xf32>
    %c0_5 = arith.constant 0 : index
    %c0_6 = arith.constant 0 : index
    %7 = vector.load %arg4[%c0_5, %c0_6] : memref<32x32xbf16, #tpu.memory_space<vmem>>, vector<32x32xbf16>
    %cst_7 = arith.constant dense<0.000000e+00> : vector<8x32xf32>
    %8 = tpu.matmul %0, %7, %cst_7 {dimension_numbers = #tpu.dot_dimension_numbers<[1], [0], [0], [1], [0, 0, 1, 1], [], []>} : vector<8x32xbf16>, vector<32x32xbf16>, vector<8x32xf32> -> vector<8x32xf32>
    %c0_8 = arith.constant 0 : index
    %c0_9 = arith.constant 0 : index
    %9 = vector.load %arg5[%c0_8, %c0_9] : memref<1x32xf32, #tpu.memory_space<vmem>>, vector<1x32xf32>
    %10 = vector.broadcast %9 : vector<1x32xf32> to vector<8x32xf32>
    %11 = arith.addf %8, %10 : vector<8x32xf32>
    %c0_10 = arith.constant 0 : index
    %c0_11 = arith.constant 0 : index
    %12 = vector.load %arg6[%c0_10, %c0_11] : memref<32x32xbf16, #tpu.memory_space<vmem>>, vector<32x32xbf16>
    %cst_12 = arith.constant dense<0.000000e+00> : vector<8x32xf32>
    %13 = tpu.matmul %0, %12, %cst_12 {dimension_numbers = #tpu.dot_dimension_numbers<[1], [0], [0], [1], [0, 0, 1, 1], [], []>} : vector<8x32xbf16>, vector<32x32xbf16>, vector<8x32xf32> -> vector<8x32xf32>
    %c0_13 = arith.constant 0 : index
    %c0_14 = arith.constant 0 : index
    %14 = vector.load %arg7[%c0_13, %c0_14] : memref<1x32xf32, #tpu.memory_space<vmem>>, vector<1x32xf32>
    %15 = vector.broadcast %14 : vector<1x32xf32> to vector<8x32xf32>
    %16 = arith.addf %13, %15 : vector<8x32xf32>
    %17 = arith.truncf %6 : vector<8x32xf32> to vector<8x32xbf16>
    %18 = arith.truncf %11 : vector<8x32xf32> to vector<8x32xbf16>
    %19 = arith.truncf %16 : vector<8x32xf32> to vector<8x32xbf16>
    %c0_15 = arith.constant 0 : index
    %c0_16 = arith.constant 0 : index
    %20 = vector.load %arg8[%c0_15, %c0_16] : memref<32x32xbf16, #tpu.memory_space<vmem>>, vector<32x32xbf16>
    %cst_17 = arith.constant 0.000000e+00 : f32
    %21 = vector.broadcast %cst_17 : f32 to vector<8x32xf32>
    %22 = vector.extract_strided_slice %17 {offsets = [0, 0], sizes = [8, 8], strides = [1, 1]} : vector<8x32xbf16> to vector<8x8xbf16>
    %23 = vector.extract_strided_slice %18 {offsets = [0, 0], sizes = [8, 8], strides = [1, 1]} : vector<8x32xbf16> to vector<8x8xbf16>
    %24 = vector.extract_strided_slice %19 {offsets = [0, 0], sizes = [8, 8], strides = [1, 1]} : vector<8x32xbf16> to vector<8x8xbf16>
    %cst_18 = arith.constant dense<0.000000e+00> : vector<8x8xf32>
    %25 = tpu.matmul %22, %23, %cst_18 {dimension_numbers = #tpu.dot_dimension_numbers<[1], [1], [0], [0], [0, 0, 1, 0], [], []>} : vector<8x8xbf16>, vector<8x8xbf16>, vector<8x8xf32> -> vector<8x8xf32>
    %cst_19 = arith.constant 0.353553385 : f32
    %26 = vector.broadcast %cst_19 : f32 to vector<8x8xf32>
    %27 = arith.mulf %25, %26 : vector<8x8xf32>
    %cst_20 = arith.constant dense<0xFF800000> : vector<8xf32>
    %28 = vector.multi_reduction <maximumf>, %27, %cst_20 [1] : vector<8x8xf32> to vector<8xf32>
    %29 = vector.shape_cast %28 : vector<8xf32> to vector<8x1xf32>
    %30 = vector.broadcast %29 : vector<8x1xf32> to vector<8x8xf32>
    %31 = arith.subf %27, %30 : vector<8x8xf32>
    %32 = math.exp %31 : vector<8x8xf32>
    %cst_21 = arith.constant dense<0.000000e+00> : vector<8xf32>
    %33 = vector.multi_reduction <add>, %32, %cst_21 [1] : vector<8x8xf32> to vector<8xf32>
    %34 = vector.shape_cast %33 : vector<8xf32> to vector<8x1xf32>
    %35 = tpu.reciprocal %34 {approx = true} : vector<8x1xf32> -> vector<8x1xf32>
    %36 = vector.broadcast %35 : vector<8x1xf32> to vector<8x8xf32>
    %37 = arith.mulf %32, %36 : vector<8x8xf32>
    %38 = arith.truncf %37 : vector<8x8xf32> to vector<8x8xbf16>
    %cst_22 = arith.constant dense<0.000000e+00> : vector<8x8xf32>
    %39 = tpu.matmul %38, %24, %cst_22 {dimension_numbers = #tpu.dot_dimension_numbers<[1], [0], [0], [1], [0, 0, 1, 1], [], []>} : vector<8x8xbf16>, vector<8x8xbf16>, vector<8x8xf32> -> vector<8x8xf32>
    %40 = arith.truncf %39 : vector<8x8xf32> to vector<8x8xbf16>
    %41 = vector.extract_strided_slice %20 {offsets = [0, 0], sizes = [8, 32], strides = [1, 1]} : vector<32x32xbf16> to vector<8x32xbf16>
    %cst_23 = arith.constant dense<0.000000e+00> : vector<8x32xf32>
    %42 = tpu.matmul %40, %41, %cst_23 {dimension_numbers = #tpu.dot_dimension_numbers<[1], [0], [0], [1], [0, 0, 1, 1], [], []>} : vector<8x8xbf16>, vector<8x32xbf16>, vector<8x32xf32> -> vector<8x32xf32>
    %43 = arith.addf %21, %42 : vector<8x32xf32>
    %44 = vector.extract_strided_slice %17 {offsets = [0, 8], sizes = [8, 8], strides = [1, 1]} : vector<8x32xbf16> to vector<8x8xbf16>
    %45 = vector.extract_strided_slice %18 {offsets = [0, 8], sizes = [8, 8], strides = [1, 1]} : vector<8x32xbf16> to vector<8x8xbf16>
    %46 = vector.extract_strided_slice %19 {offsets = [0, 8], sizes = [8, 8], strides = [1, 1]} : vector<8x32xbf16> to vector<8x8xbf16>
    %cst_24 = arith.constant dense<0.000000e+00> : vector<8x8xf32>
    %47 = tpu.matmul %44, %45, %cst_24 {dimension_numbers = #tpu.dot_dimension_numbers<[1], [1], [0], [0], [0, 0, 1, 0], [], []>} : vector<8x8xbf16>, vector<8x8xbf16>, vector<8x8xf32> -> vector<8x8xf32>
    %cst_25 = arith.constant 0.353553385 : f32
    %48 = vector.broadcast %cst_25 : f32 to vector<8x8xf32>
    %49 = arith.mulf %47, %48 : vector<8x8xf32>
    %cst_26 = arith.constant dense<0xFF800000> : vector<8xf32>
    %50 = vector.multi_reduction <maximumf>, %49, %cst_26 [1] : vector<8x8xf32> to vector<8xf32>
    %51 = vector.shape_cast %50 : vector<8xf32> to vector<8x1xf32>
    %52 = vector.broadcast %51 : vector<8x1xf32> to vector<8x8xf32>
    %53 = arith.subf %49, %52 : vector<8x8xf32>
    %54 = math.exp %53 : vector<8x8xf32>
    %cst_27 = arith.constant dense<0.000000e+00> : vector<8xf32>
    %55 = vector.multi_reduction <add>, %54, %cst_27 [1] : vector<8x8xf32> to vector<8xf32>
    %56 = vector.shape_cast %55 : vector<8xf32> to vector<8x1xf32>
    %57 = tpu.reciprocal %56 {approx = true} : vector<8x1xf32> -> vector<8x1xf32>
    %58 = vector.broadcast %57 : vector<8x1xf32> to vector<8x8xf32>
    %59 = arith.mulf %54, %58 : vector<8x8xf32>
    %60 = arith.truncf %59 : vector<8x8xf32> to vector<8x8xbf16>
    %cst_28 = arith.constant dense<0.000000e+00> : vector<8x8xf32>
    %61 = tpu.matmul %60, %46, %cst_28 {dimension_numbers = #tpu.dot_dimension_numbers<[1], [0], [0], [1], [0, 0, 1, 1], [], []>} : vector<8x8xbf16>, vector<8x8xbf16>, vector<8x8xf32> -> vector<8x8xf32>
    %62 = arith.truncf %61 : vector<8x8xf32> to vector<8x8xbf16>
    %63 = vector.extract_strided_slice %20 {offsets = [8, 0], sizes = [8, 32], strides = [1, 1]} : vector<32x32xbf16> to vector<8x32xbf16>
    %cst_29 = arith.constant dense<0.000000e+00> : vector<8x32xf32>
    %64 = tpu.matmul %62, %63, %cst_29 {dimension_numbers = #tpu.dot_dimension_numbers<[1], [0], [0], [1], [0, 0, 1, 1], [], []>} : vector<8x8xbf16>, vector<8x32xbf16>, vector<8x32xf32> -> vector<8x32xf32>
    %65 = arith.addf %43, %64 : vector<8x32xf32>
    %66 = vector.extract_strided_slice %17 {offsets = [0, 16], sizes = [8, 8], strides = [1, 1]} : vector<8x32xbf16> to vector<8x8xbf16>
    %67 = vector.extract_strided_slice %18 {offsets = [0, 16], sizes = [8, 8], strides = [1, 1]} : vector<8x32xbf16> to vector<8x8xbf16>
    %68 = vector.extract_strided_slice %19 {offsets = [0, 16], sizes = [8, 8], strides = [1, 1]} : vector<8x32xbf16> to vector<8x8xbf16>
    %cst_30 = arith.constant dense<0.000000e+00> : vector<8x8xf32>
    %69 = tpu.matmul %66, %67, %cst_30 {dimension_numbers = #tpu.dot_dimension_numbers<[1], [1], [0], [0], [0, 0, 1, 0], [], []>} : vector<8x8xbf16>, vector<8x8xbf16>, vector<8x8xf32> -> vector<8x8xf32>
    %cst_31 = arith.constant 0.353553385 : f32
    %70 = vector.broadcast %cst_31 : f32 to vector<8x8xf32>
    %71 = arith.mulf %69, %70 : vector<8x8xf32>
    %cst_32 = arith.constant dense<0xFF800000> : vector<8xf32>
    %72 = vector.multi_reduction <maximumf>, %71, %cst_32 [1] : vector<8x8xf32> to vector<8xf32>
    %73 = vector.shape_cast %72 : vector<8xf32> to vector<8x1xf32>
    %74 = vector.broadcast %73 : vector<8x1xf32> to vector<8x8xf32>
    %75 = arith.subf %71, %74 : vector<8x8xf32>
    %76 = math.exp %75 : vector<8x8xf32>
    %cst_33 = arith.constant dense<0.000000e+00> : vector<8xf32>
    %77 = vector.multi_reduction <add>, %76, %cst_33 [1] : vector<8x8xf32> to vector<8xf32>
    %78 = vector.shape_cast %77 : vector<8xf32> to vector<8x1xf32>
    %79 = tpu.reciprocal %78 {approx = true} : vector<8x1xf32> -> vector<8x1xf32>
    %80 = vector.broadcast %79 : vector<8x1xf32> to vector<8x8xf32>
    %81 = arith.mulf %76, %80 : vector<8x8xf32>
    %82 = arith.truncf %81 : vector<8x8xf32> to vector<8x8xbf16>
    %cst_34 = arith.constant dense<0.000000e+00> : vector<8x8xf32>
    %83 = tpu.matmul %82, %68, %cst_34 {dimension_numbers = #tpu.dot_dimension_numbers<[1], [0], [0], [1], [0, 0, 1, 1], [], []>} : vector<8x8xbf16>, vector<8x8xbf16>, vector<8x8xf32> -> vector<8x8xf32>
    %84 = arith.truncf %83 : vector<8x8xf32> to vector<8x8xbf16>
    %85 = vector.extract_strided_slice %20 {offsets = [16, 0], sizes = [8, 32], strides = [1, 1]} : vector<32x32xbf16> to vector<8x32xbf16>
    %cst_35 = arith.constant dense<0.000000e+00> : vector<8x32xf32>
    %86 = tpu.matmul %84, %85, %cst_35 {dimension_numbers = #tpu.dot_dimension_numbers<[1], [0], [0], [1], [0, 0, 1, 1], [], []>} : vector<8x8xbf16>, vector<8x32xbf16>, vector<8x32xf32> -> vector<8x32xf32>
    %87 = arith.addf %65, %86 : vector<8x32xf32>
    %88 = vector.extract_strided_slice %17 {offsets = [0, 24], sizes = [8, 8], strides = [1, 1]} : vector<8x32xbf16> to vector<8x8xbf16>
    %89 = vector.extract_strided_slice %18 {offsets = [0, 24], sizes = [8, 8], strides = [1, 1]} : vector<8x32xbf16> to vector<8x8xbf16>
    %90 = vector.extract_strided_slice %19 {offsets = [0, 24], sizes = [8, 8], strides = [1, 1]} : vector<8x32xbf16> to vector<8x8xbf16>
    %cst_36 = arith.constant dense<0.000000e+00> : vector<8x8xf32>
    %91 = tpu.matmul %88, %89, %cst_36 {dimension_numbers = #tpu.dot_dimension_numbers<[1], [1], [0], [0], [0, 0, 1, 0], [], []>} : vector<8x8xbf16>, vector<8x8xbf16>, vector<8x8xf32> -> vector<8x8xf32>
    %cst_37 = arith.constant 0.353553385 : f32
    %92 = vector.broadcast %cst_37 : f32 to vector<8x8xf32>
    %93 = arith.mulf %91, %92 : vector<8x8xf32>
    %cst_38 = arith.constant dense<0xFF800000> : vector<8xf32>
    %94 = vector.multi_reduction <maximumf>, %93, %cst_38 [1] : vector<8x8xf32> to vector<8xf32>
    %95 = vector.shape_cast %94 : vector<8xf32> to vector<8x1xf32>
    %96 = vector.broadcast %95 : vector<8x1xf32> to vector<8x8xf32>
    %97 = arith.subf %93, %96 : vector<8x8xf32>
    %98 = math.exp %97 : vector<8x8xf32>
    %cst_39 = arith.constant dense<0.000000e+00> : vector<8xf32>
    %99 = vector.multi_reduction <add>, %98, %cst_39 [1] : vector<8x8xf32> to vector<8xf32>
    %100 = vector.shape_cast %99 : vector<8xf32> to vector<8x1xf32>
    %101 = tpu.reciprocal %100 {approx = true} : vector<8x1xf32> -> vector<8x1xf32>
    %102 = vector.broadcast %101 : vector<8x1xf32> to vector<8x8xf32>
    %103 = arith.mulf %98, %102 : vector<8x8xf32>
    %104 = arith.truncf %103 : vector<8x8xf32> to vector<8x8xbf16>
    %cst_40 = arith.constant dense<0.000000e+00> : vector<8x8xf32>
    %105 = tpu.matmul %104, %90, %cst_40 {dimension_numbers = #tpu.dot_dimension_numbers<[1], [0], [0], [1], [0, 0, 1, 1], [], []>} : vector<8x8xbf16>, vector<8x8xbf16>, vector<8x8xf32> -> vector<8x8xf32>
    %106 = arith.truncf %105 : vector<8x8xf32> to vector<8x8xbf16>
    %107 = vector.extract_strided_slice %20 {offsets = [24, 0], sizes = [8, 32], strides = [1, 1]} : vector<32x32xbf16> to vector<8x32xbf16>
    %cst_41 = arith.constant dense<0.000000e+00> : vector<8x32xf32>
    %108 = tpu.matmul %106, %107, %cst_41 {dimension_numbers = #tpu.dot_dimension_numbers<[1], [0], [0], [1], [0, 0, 1, 1], [], []>} : vector<8x8xbf16>, vector<8x32xbf16>, vector<8x32xf32> -> vector<8x32xf32>
    %109 = arith.addf %87, %108 : vector<8x32xf32>
    %c0_42 = arith.constant 0 : index
    %c0_43 = arith.constant 0 : index
    %110 = vector.load %arg9[%c0_42, %c0_43] : memref<1x32xf32, #tpu.memory_space<vmem>>, vector<1x32xf32>
    %111 = vector.broadcast %110 : vector<1x32xf32> to vector<8x32xf32>
    %112 = arith.addf %109, %111 : vector<8x32xf32>
    %113 = arith.addf %1, %112 : vector<8x32xf32>
    %cst_44 = arith.constant dense<0.000000e+00> : vector<8xf32>
    %114 = vector.multi_reduction <add>, %113, %cst_44 [1] : vector<8x32xf32> to vector<8xf32>
    %115 = vector.shape_cast %114 : vector<8xf32> to vector<8x1xf32>
    %cst_45 = arith.constant 3.200000e+01 : f32
    %116 = vector.broadcast %cst_45 : f32 to vector<8x1xf32>
    %117 = arith.divf %115, %116 : vector<8x1xf32>
    %118 = vector.broadcast %117 : vector<8x1xf32> to vector<8x32xf32>
    %119 = arith.subf %113, %118 : vector<8x32xf32>
    %120 = arith.mulf %119, %119 : vector<8x32xf32>
    %cst_46 = arith.constant dense<0.000000e+00> : vector<8xf32>
    %121 = vector.multi_reduction <add>, %120, %cst_46 [1] : vector<8x32xf32> to vector<8xf32>
    %122 = vector.shape_cast %121 : vector<8xf32> to vector<8x1xf32>
    %cst_47 = arith.constant 3.200000e+01 : f32
    %123 = vector.broadcast %cst_47 : f32 to vector<8x1xf32>
    %124 = arith.divf %122, %123 : vector<8x1xf32>
    %125 = vector.broadcast %117 : vector<8x1xf32> to vector<8x32xf32>
    %126 = arith.subf %113, %125 : vector<8x32xf32>
    %cst_48 = arith.constant 9.99999974E-6 : f32
    %127 = vector.broadcast %cst_48 : f32 to vector<8x1xf32>
    %128 = arith.addf %124, %127 : vector<8x1xf32>
    %129 = math.rsqrt %128 : vector<8x1xf32>
    %130 = vector.broadcast %129 : vector<8x1xf32> to vector<8x32xf32>
    %131 = arith.mulf %126, %130 : vector<8x32xf32>
    %c0_49 = arith.constant 0 : index
    %c0_50 = arith.constant 0 : index
    %132 = vector.load %arg14[%c0_49, %c0_50] : memref<1x32xf32, #tpu.memory_space<vmem>>, vector<1x32xf32>
    %133 = vector.broadcast %132 : vector<1x32xf32> to vector<8x32xf32>
    %134 = arith.mulf %131, %133 : vector<8x32xf32>
    %c0_51 = arith.constant 0 : index
    %c0_52 = arith.constant 0 : index
    %135 = vector.load %arg15[%c0_51, %c0_52] : memref<1x32xf32, #tpu.memory_space<vmem>>, vector<1x32xf32>
    %136 = vector.broadcast %135 : vector<1x32xf32> to vector<8x32xf32>
    %137 = arith.addf %134, %136 : vector<8x32xf32>
    %138 = arith.truncf %137 : vector<8x32xf32> to vector<8x32xbf16>
    %c0_53 = arith.constant 0 : index
    %c0_54 = arith.constant 0 : index
    %139 = vector.load %arg10[%c0_53, %c0_54] : memref<32x64xbf16, #tpu.memory_space<vmem>>, vector<32x64xbf16>
    %cst_55 = arith.constant dense<0.000000e+00> : vector<8x64xf32>
    %140 = tpu.matmul %138, %139, %cst_55 {dimension_numbers = #tpu.dot_dimension_numbers<[1], [0], [0], [1], [0, 0, 1, 1], [], []>} : vector<8x32xbf16>, vector<32x64xbf16>, vector<8x64xf32> -> vector<8x64xf32>
    %c0_56 = arith.constant 0 : index
    %c0_57 = arith.constant 0 : index
    %141 = vector.load %arg11[%c0_56, %c0_57] : memref<1x64xf32, #tpu.memory_space<vmem>>, vector<1x64xf32>
    %142 = vector.broadcast %141 : vector<1x64xf32> to vector<8x64xf32>
    %143 = arith.addf %140, %142 : vector<8x64xf32>
    %cst_58 = arith.constant 0.000000e+00 : f32
    %144 = vector.broadcast %cst_58 : f32 to vector<8x64xf32>
    %145 = arith.maximumf %143, %144 : vector<8x64xf32>
    %146 = arith.truncf %145 : vector<8x64xf32> to vector<8x64xbf16>
    %c0_59 = arith.constant 0 : index
    %c0_60 = arith.constant 0 : index
    %147 = vector.load %arg12[%c0_59, %c0_60] : memref<64x32xbf16, #tpu.memory_space<vmem>>, vector<64x32xbf16>
    %cst_61 = arith.constant dense<0.000000e+00> : vector<8x32xf32>
    %148 = tpu.matmul %146, %147, %cst_61 {dimension_numbers = #tpu.dot_dimension_numbers<[1], [0], [0], [1], [0, 0, 1, 1], [], []>} : vector<8x64xbf16>, vector<64x32xbf16>, vector<8x32xf32> -> vector<8x32xf32>
    %c0_62 = arith.constant 0 : index
    %c0_63 = arith.constant 0 : index
    %149 = vector.load %arg13[%c0_62, %c0_63] : memref<1x32xf32, #tpu.memory_space<vmem>>, vector<1x32xf32>
    %150 = vector.broadcast %149 : vector<1x32xf32> to vector<8x32xf32>
    %151 = arith.addf %148, %150 : vector<8x32xf32>
    %152 = arith.addf %137, %151 : vector<8x32xf32>
    %cst_64 = arith.constant dense<0.000000e+00> : vector<8xf32>
    %153 = vector.multi_reduction <add>, %152, %cst_64 [1] : vector<8x32xf32> to vector<8xf32>
    %154 = vector.shape_cast %153 : vector<8xf32> to vector<8x1xf32>
    %cst_65 = arith.constant 3.200000e+01 : f32
    %155 = vector.broadcast %cst_65 : f32 to vector<8x1xf32>
    %156 = arith.divf %154, %155 : vector<8x1xf32>
    %157 = vector.broadcast %156 : vector<8x1xf32> to vector<8x32xf32>
    %158 = arith.subf %152, %157 : vector<8x32xf32>
    %159 = arith.mulf %158, %158 : vector<8x32xf32>
    %cst_66 = arith.constant dense<0.000000e+00> : vector<8xf32>
    %160 = vector.multi_reduction <add>, %159, %cst_66 [1] : vector<8x32xf32> to vector<8xf32>
    %161 = vector.shape_cast %160 : vector<8xf32> to vector<8x1xf32>
    %cst_67 = arith.constant 3.200000e+01 : f32
    %162 = vector.broadcast %cst_67 : f32 to vector<8x1xf32>
    %163 = arith.divf %161, %162 : vector<8x1xf32>
    %164 = vector.broadcast %156 : vector<8x1xf32> to vector<8x32xf32>
    %165 = arith.subf %152, %164 : vector<8x32xf32>
    %cst_68 = arith.constant 9.99999974E-6 : f32
    %166 = vector.broadcast %cst_68 : f32 to vector<8x1xf32>
    %167 = arith.addf %163, %166 : vector<8x1xf32>
    %168 = math.rsqrt %167 : vector<8x1xf32>
    %169 = vector.broadcast %168 : vector<8x1xf32> to vector<8x32xf32>
    %170 = arith.mulf %165, %169 : vector<8x32xf32>
    %c0_69 = arith.constant 0 : index
    %c0_70 = arith.constant 0 : index
    %171 = vector.load %arg16[%c0_69, %c0_70] : memref<1x32xf32, #tpu.memory_space<vmem>>, vector<1x32xf32>
    %172 = vector.broadcast %171 : vector<1x32xf32> to vector<8x32xf32>
    %173 = arith.mulf %170, %172 : vector<8x32xf32>
    %c0_71 = arith.constant 0 : index
    %c0_72 = arith.constant 0 : index
    %174 = vector.load %arg17[%c0_71, %c0_72] : memref<1x32xf32, #tpu.memory_space<vmem>>, vector<1x32xf32>
    %175 = vector.broadcast %174 : vector<1x32xf32> to vector<8x32xf32>
    %176 = arith.addf %173, %175 : vector<8x32xf32>
    %177 = arith.truncf %176 : vector<8x32xf32> to vector<8x32xbf16>
    %c0_73 = arith.constant 0 : index
    %c0_74 = arith.constant 0 : index
    %178 = vector.load %arg18[%c0_73, %c0_74] : memref<8x32xbf16, #tpu.memory_space<vmem>>, vector<8x32xbf16>
    tpu.vector_store %arg18[%c0_73, %c0_74], %177 {strides = array<i32>} : memref<8x32xbf16, #tpu.memory_space<vmem>>, vector<8x32xbf16>,
    return
  }
  func.func @transform_0(%arg0: i32) -> (i32, i32) {
    %c0_i32 = arith.constant 0 : i32
    %c0_i32_0 = arith.constant 0 : i32
    return %arg0, %c0_i32 : i32, i32
  }
  func.func @transform_1(%arg0: i32) -> (i32, i32) {
    %c0_i32 = arith.constant 0 : i32
    %c0_i32_0 = arith.constant 0 : i32
    %c0_i32_1 = arith.constant 0 : i32
    return %c0_i32, %c0_i32_0 : i32, i32
  }
  func.func @transform_2(%arg0: i32) -> (i32, i32) {
    %c0_i32 = arith.constant 0 : i32
    %c0_i32_0 = arith.constant 0 : i32
    %c0_i32_1 = arith.constant 0 : i32
    return %c0_i32, %c0_i32_0 : i32, i32
  }
  func.func @transform_3(%arg0: i32) -> (i32, i32) {
    %c0_i32 = arith.constant 0 : i32
    %c0_i32_0 = arith.constant 0 : i32
    %c0_i32_1 = arith.constant 0 : i32
    return %c0_i32, %c0_i32_0 : i32, i32
  }
  func.func @transform_4(%arg0: i32) -> (i32, i32) {
    %c0_i32 = arith.constant 0 : i32
    %c0_i32_0 = arith.constant 0 : i32
    %c0_i32_1 = arith.constant 0 : i32
    return %c0_i32, %c0_i32_0 : i32, i32
  }
  func.func @transform_5(%arg0: i32) -> (i32, i32) {
    %c0_i32 = arith.constant 0 : i32
    %c0_i32_0 = arith.constant 0 : i32
    %c0_i32_1 = arith.constant 0 : i32
    return %c0_i32, %c0_i32_0 : i32, i32
  }
  func.func @transform_6(%arg0: i32) -> (i32, i32) {
    %c0_i32 = arith.constant 0 : i32
    %c0_i32_0 = arith.constant 0 : i32
    %c0_i32_1 = arith.constant 0 : i32
    return %c0_i32, %c0_i32_0 : i32, i32
  }
  func.func @transform_7(%arg0: i32) -> (i32, i32) {
    %c0_i32 = arith.constant 0 : i32
    %c0_i32_0 = arith.constant 0 : i32
    %c0_i32_1 = arith.constant 0 : i32
    return %c0_i32, %c0_i32_0 : i32, i32
  }
  func.func @transform_8(%arg0: i32) -> (i32, i32) {
    %c0_i32 = arith.constant 0 : i32
    %c0_i32_0 = arith.constant 0 : i32
    %c0_i32_1 = arith.constant 0 : i32
    return %c0_i32, %c0_i32_0 : i32, i32
  }
  func.func @transform_9(%arg0: i32) -> (i32, i32) {
    %c0_i32 = arith.constant 0 : i32
    %c0_i32_0 = arith.constant 0 : i32
    %c0_i32_1 = arith.constant 0 : i32
    return %c0_i32, %c0_i32_0 : i32, i32
  }
  func.func @transform_10(%arg0: i32) -> (i32, i32) {
    %c0_i32 = arith.constant 0 : i32
    %c0_i32_0 = arith.constant 0 : i32
    %c0_i32_1 = arith.constant 0 : i32
    return %c0_i32, %c0_i32_0 : i32, i32
  }
  func.func @transform_11(%arg0: i32) -> (i32, i32) {
    %c0_i32 = arith.constant 0 : i32
    %c0_i32_0 = arith.constant 0 : i32
    %c0_i32_1 = arith.constant 0 : i32
    return %c0_i32, %c0_i32_0 : i32, i32
  }
  func.func @transform_12(%arg0: i32) -> (i32, i32) {
    %c0_i32 = arith.constant 0 : i32
    %c0_i32_0 = arith.constant 0 : i32
    %c0_i32_1 = arith.constant 0 : i32
    return %c0_i32, %c0_i32_0 : i32, i32
  }
  func.func @transform_13(%arg0: i32) -> (i32, i32) {
    %c0_i32 = arith.constant 0 : i32
    %c0_i32_0 = arith.constant 0 : i32
    %c0_i32_1 = arith.constant 0 : i32
    return %c0_i32, %c0_i32_0 : i32, i32
  }
  func.func @transform_14(%arg0: i32) -> (i32, i32) {
    %c0_i32 = arith.constant 0 : i32
    %c0_i32_0 = arith.constant 0 : i32
    %c0_i32_1 = arith.constant 0 : i32
    return %c0_i32, %c0_i32_0 : i32, i32
  }
  func.func @transform_15(%arg0: i32) -> (i32, i32) {
    %c0_i32 = arith.constant 0 : i32
    %c0_i32_0 = arith.constant 0 : i32
    %c0_i32_1 = arith.constant 0 : i32
    return %c0_i32, %c0_i32_0 : i32, i32
  }
  func.func @transform_16(%arg0: i32) -> (i32, i32) {
    %c0_i32 = arith.constant 0 : i32
    %c0_i32_0 = arith.constant 0 : i32
    %c0_i32_1 = arith.constant 0 : i32
    return %c0_i32, %c0_i32_0 : i32, i32
  }
  func.func @transform_17(%arg0: i32) -> (i32, i32) {
    %c0_i32 = arith.constant 0 : i32
    %c0_i32_0 = arith.constant 0 : i32
    return %arg0, %c0_i32 : i32, i32
  }
}

</mosaic_0001>

<bundles_post_ra>
// kernel: tpu_custom_call.1
= control target key start
LH: loop header
LB: loop body
LE: loop exit
PB: predicated region body
PF: predicated region fallthrough
CT: control target
= control target key end

     0   :  { %s2027_s0 = inlined_call_operand.hbm [shape: bf16[16,32], index: 0, kind: input, shape index: {}]   ;;  %s2028_s1 = inlined_call_operand.vmem [shape: bf16[32,32], index: 1, kind: input, shape index: {}]   ;;  %s2029_s2 = inlined_call_operand.vmem [shape: f32[1,32], index: 2, kind: input, shape index: {}]   ;;  %s2030_s3 = inlined_call_operand.vmem [shape: bf16[32,32], index: 3, kind: input, shape index: {}]   ;;  %s2031_s4 = inlined_call_operand.vmem [shape: f32[1,32], index: 4, kind: input, shape index: {}]   ;;  %s2032_s5 = inlined_call_operand.vmem [shape: bf16[32,32], index: 5, kind: input, shape index: {}]   ;;  %s2033_s6 = inlined_call_operand.vmem [shape: f32[1,32], index: 6, kind: input, shape index: {}]   ;;  %s2034_s7 = inlined_call_operand.hbm [shape: bf16[32,32], index: 7, kind: input, shape index: {}]   ;;  %s2035_s8 = inlined_call_operand.vmem [shape: f32[1,32], index: 8, kind: input, shape index: {}]   ;;  %s2036_s9 = inlined_call_operand.hbm [shape: bf16[32,64], index: 9, kind: input, shape index: {}]   ;;  %s2037_s10 = inlined_call_operand.vmem [shape: f32[1,64], index: 10, kind: input, shape index: {}]   ;;  %s2038_s11 = inlined_call_operand.vmem [shape: bf16[64,32], index: 11, kind: input, shape index: {}]   ;;  %s2039_s12 = inlined_call_operand.vmem [shape: f32[1,32], index: 12, kind: input, shape index: {}]   ;;  %s2040_s13 = inlined_call_operand.vmem [shape: f32[1,32], index: 13, kind: input, shape index: {}]   ;;  %s2041_s14 = inlined_call_operand.vmem [shape: f32[1,32], index: 14, kind: input, shape index: {}]   ;;  %s2042_s15 = inlined_call_operand.vmem [shape: f32[1,32], index: 15, kind: input, shape index: {}]   ;;  %s2043_s16 = inlined_call_operand.vmem [shape: f32[1,32], index: 16, kind: input, shape index: {}]   ;;  %s2044_s17 = inlined_call_operand.hbm [shape: bf16[16,32], index: 17, kind: output, shape index: {}]  }
   0x1   :  { %2055 = sst [smem:[#allocation18_spill]] %s2027_s0 }
   0x2   :  { %2056 = sst [smem:[#allocation19_spill]] %s2028_s1 }
   0x3   :  { %2057 = sst [smem:[#allocation20_spill]] %s2029_s2 }
   0x4   :  { %2058 = sst [smem:[#allocation21_spill]] %s2034_s7 }
   0x5   :  { %2059 = sst [smem:[#allocation22_spill]] %s2036_s9 }
   0x6   :  { %2060 = sst [smem:[#allocation23_spill]] %s2042_s15 }
   0x7   :  { %2061 = sst [smem:[#allocation24_spill]] %s2043_s16 }
   0x8   :  { %2062 = sst [smem:[#allocation25_spill]] %s2044_s17 }
   0x9   :  { %22 = vsyncpa [#allocation3], 0 }
   0xa   :  { %24 = vsyncpa [#allocation3 + $0x1], 0 }
   0xb   :  { %25 = vsyncpa [#allocation6], 0 }
   0xc   :  { %26 = vsyncpa [#allocation4], 0 }
   0xd   :  { %28 = vsyncpa [#allocation4 + $0x1], 0  ;;  %s1763_s24 = smov 0   ;;  %s1765_s25 = smov 0  }
   0xe   :  { %s1767_s26 = smov 0   ;;  %s1769_s27 = smov 0  }
   0xf LB: > { %2063 = sst [smem:[#allocation12_spill]] %s1651_s24  ;;  %s1787_s30 = sadd.s32 4294967295, %s1663_s27   ;;  %s1663_s27 = sphi %s1769_s27, %s2088_s27   ;;  %s1659_s26 = sphi %s1767_s26, %s2090_s26   ;;  %s1655_s25 = sphi %s1765_s25, %s2092_s25   ;;  %s1651_s24 = sphi %s1763_s24, %s2091_s24  }
  0x10   : > { %2064 = sst [smem:[#allocation13_spill]] %s1659_s26  ;;  %p1306_p0 = scmp.ge.s32.totalorder %s1663_s27, 1 }
  0x11   : > { %s2065_s7 = sld [smem:[#allocation21_spill]]  ;;  %p55_p1 = scmp.eq.s32.totalorder %s1787_s30, 0 }
  0x12   : > { %p427_p2 = scmp.lt.s32.totalorder %s1663_s27, 3  ;;  %s1665_s19 = smov [#allocation5]  }
  0x13   : > { %s458_s1 = sshll.u32 %s1665_s19, 4  ;;  %s2067_s9 = sld [smem:[#allocation22_spill]]  ;;  %s459_s1 = int_to_ptr.vmem [resolvable:$true] %s458_s1 }
  0x14   : > { %p1792_p3 = pnand %p1306_p0, %p427_p2  ;;  %s1666_s23 = smov [#allocation7]  }
  0x15   : > { %s475_s28 = sshll.u32 %s1666_s23, 4  ;;  %s1667_s29 = smov 64   ;;  %s476_s28 = int_to_ptr.vmem [resolvable:$true] %s475_s28 }
  0x16   : > { %p1410_p4 = pneg %p1792_p3  ;;  %s1668_s19 = smov 4  }
  0x17   : > { %s456_s0 = sshll.u32 %s2065_s7, 4  ;;  %s1305_s20 = sadd.s32 4294967294, %s1663_s27   ;;  %s457_s0 = int_to_ptr.hbm [resolvable:$true] %s456_s0 }
  0x18   : > { %p1411_p6 = pnand %p1410_p4, %p55_p1  ;;  %s1806_s21 = sadd.s32 1, %s1663_s27  }
  0x19   : > { %s473_s22 = sshll.u32 %s2067_s9, 4  ;;  %2068 = sst [smem:[#allocation14_spill]] %s1806_s21  ;;  %s474_s22 = int_to_ptr.hbm [resolvable:$true] %s473_s22 }
  0x1a   : > { %1413 = dma.hbm_to_vmem [thread:$0]  (!%p1411_p6), %s457_s0, 256, %s459_s1, [#allocation6], %s1667_s29, %s1667_s29, %s1668_s19  }
  0x1b   : > { %1416 = dma.hbm_to_vmem [thread:$0]  (!%p1411_p6), %s474_s22, 256, %s476_s28, [#allocation6], %s1667_s29, %s1667_s29, %s1668_s19  }
  0x1c   : > { %s38_s7 = ssub.s32 %s1663_s27, %s1806_s21  ;;  %s41_s9 = sadd.s32 1, %s1659_s26 }
  0x1d   : > { %p39_p7 = scmp.eq.s32.totalorder %s38_s7, 0  ;;  %p48_p8 = scmp.ne.s32.totalorder %s1659_s26, %s1655_s25 }
  0x1e   : > { %p49_p9 = scmp.eq.s32.totalorder %s1663_s27, 0  ;;  %p54_p10 = scmp.ne.s32.totalorder %s1655_s25, %s1651_s24 }
  0x1f   : > { %s1817_s23 = scalar_select %p39_p7, %s1659_s26, %s41_s9  }
  0x20   : > { %p1819_p11 = por %p49_p9, %p48_p8  ;;  %p1825_p12 = por %p55_p1, %p54_p10 }
  0x21   : > { %2069 = sst [smem:[#allocation15_spill]] %s1817_s23  ;;  %p414_p13 = scmp.eq.s32.totalorder %s1787_s30, 1 }
  0x22   : > { %p420_p0 = scmp.eq.s32.totalorder %s1305_s20, 1  ;;  %p1427_p2 = scmp.lt.s32.totalorder %s1663_s27, 2 }
  0x23   : > { %s510_s1 = sand.u32 1, %s1659_s26   ;;  %p1832_p4 = por %p414_p13, %p48_p8 }
  0x24   : > { %p1836_p6 = por %p420_p0, %p54_p10  ;;  %s1310_s22 = sshll.u32 %s510_s1, 2 }
  0x25   : > { %s2072_s7 = scalar_select %p1832_p4, 1, 0 }
  0x26   : > { %s2074_s9 = scalar_select %p1836_p6, 1, 0 }
  0x27   : > { %2073 = sst [smem:[#allocation16_spill]] %s2072_s7  ;;  %s1311_s28 = sshll.u32 %s1663_s27, 2 }
  0x28   : > { %2075 = sst [smem:[#allocation17_spill]] %s2074_s9  ;;  %s514_s24 = scalar_lea.vmem [#allocation2], %s1310_s22 }
  0x29   : > { %s2076_s23 = sld [smem:[#allocation18_spill]]  ;;  %s522_s16 = sshll.u32 %s514_s24, 4  ;;  %s523_s16 = int_to_ptr.vmem [resolvable:$true] %s522_s16 }
  0x2a   : > { %p1846_p7 = pnand %p1427_p2, %p1819_p11  ;;  %s511_s26 = scalar_lea.sflag [#allocation3], %s510_s1 }
  0x2c   : > { %p1567_p9 = pneg %p1846_p7 }
  0x2f   : > { %s518_s21 = scalar_lea.hbm %s2076_s23, %s1311_s28 }
  0x30   : > { %s520_s15 = sshll.u32 %s518_s21, 4  ;;  %s1570_s21 = scalar_lea.hbm %s2076_s23, 8  ;;  %s521_s15 = int_to_ptr.hbm [resolvable:$true] %s520_s15 }
  0x31   : > { %s1563_s7 = sshra.s32 %s521_s15, 4  ;;  %s1564_s7 = int_to_ptr.hbm [resolvable:$true] %s1563_s7 }
  0x32   : > { %s1565_s9 = scalar_lea.hbm %s1564_s7, 4  ;;  %p1571_p11 = scmp.lt.s32.totalorder %s1564_s7, %s2076_s23 }
  0x33   : > { %p1566_p8 = scmp.ne.s32.totalorder %s1564_s7, %s1565_s9  ;;  %p1572_p0 = scmp.lt.s32.totalorder %s1570_s21, %s1565_s9 }
  0x35   : > { %p1568_p10 = pnand %p1567_p9, %p1566_p8  ;;  %p1573_p2 = por %p1572_p0, %p1571_p11 }
  0x37   : > { %p1569_p13 = pneg %p1568_p10 }
  0x39   : > { %p1574_p5 = pnand %p1573_p2, %p1569_p13 }
  0x3b   : > { %1577 = shalt.err (!%p1574_p5)
}
  0x3c   : > { %1420 = dma.hbm_to_vmem [thread:$0]  (!%p1846_p7), %s521_s15, 64, %s523_s16, %s511_s26  }
  0x3d   : > { %531 = sbr.rel (%p1792_p3) target bundleno = 2222 (0x8ae), region = 88  ;;  %s1863_s1 = sand.u32 (!%p1792_p3), 1, %s1655_s25  }
  0x3e   : > { %s1313_s29 = sshll.u32 (!%p1792_p3), %s1863_s1, 2  ;;  %s534_s19 = scalar_lea.sflag (!%p1792_p3), [#allocation3], %s1863_s1 }
  0x3f   : > { %s537_s7 = scalar_lea.vmem (!%p1792_p3), [#allocation2], %s1313_s29 }
  0x42   : > { %1638 = dma.done.wait (%p1825_p12), %s534_s19, 64  }
  0x43   : > { %1640 = vsyncadd (%p1825_p12), %s534_s19, 4294967232 }
  0x44   : > { %1642 = dma.done.wait (%p55_p1), [#allocation6], 512  }
  0x45   : > { %1644 = vsyncadd (%p55_p1), [#allocation6], 4294966784  ;;  %s2078_s26 = sld [smem:[#allocation19_spill]]  ;;  %v1389_v1 = vld [vmem:[%s2030_s3 + $0x8] sm:$0xff]  ;;  %v1388_v3 = vld [vmem:[%s2030_s3] sm:$0xff]  ;;  %vm622_vm0 = vcmask 261120  }
  0x46   : > { %665 = vmatpush.bf16.msra.mxu1 %v1389_v1  ;;  %v1889_v4 = vld [vmem:[%s537_s7] sm:$0xf]  ;;  %s2080_s2 = sld [smem:[#allocation20_spill]]  ;;  %vm712_vm1 = vcmask 64512   ;;  %s1669_s7 = smov 112   ;;  %v1391_v20 = vld [vmem:[%s2032_s5 + $0x8] sm:$0xff] }
  0x47   : > { %v1472_v6 = vld [vmem:[%s2031_s4] ss:$0 sm:$0xff]  ;;  %s1670_s16 = smov 120   ;;  %698 = vmatpush.bf16.msra.mxu2 %v1391_v20  ;;  %vm748_vm2 = vcmask 1043456   ;;  %v708_v53 = vld [vmem:[#allocation5] sm:$0xf] }
  0x48   : > { %v1390_v22 = vld [vmem:[%s2032_s5] sm:$0xff]  ;;  %v856_v54 = vsel %vm748_vm2, %v708_v53, 0  ;;  %vm1147_vm7 = vcmask 523264   ;;  %s2081_s20 = sld [smem:[#allocation23_spill]]  ;;  %vm1198_vm11 = vcmask 257024  }
  0x49   : > { %v1473_v46 = vld [vmem:[%s2033_s6] ss:$0 sm:$0xff]  ;;  %s2082_s0 = sld [smem:[#allocation24_spill]] }
  0x4a   : > { %666 = vmatpush.bf16.msra.mxu1 %v1388_v3  ;;  %s2083_s17 = sld [smem:[#allocation25_spill]] }
  0x4b   : > { %s2079_s18 = smov %s2078_s26  ;;  %v1387_v0 = vld [vmem:[%s2078_s26 + $0x8] sm:$0xff]  ;;  %s1671_s26 = smov 104   ;;  %699 = vmatpush.bf16.msra.mxu2 %v1390_v22 }
  0x4c   : > { %v1386_v2 = vld [vmem:[%s2079_s18] sm:$0xff]  ;;  %632 = vmatpush.bf16.msra.mxu0 %v1387_v0 }
  0x4d   : > { %1334 = vmatmul.msk.bf16.vlgmr.msra.gmra.mxu1 %vm622_vm0, %v1889_v4  ;;  %v1471_v5 = vld [vmem:[%s2080_s2] ss:$0 sm:$0xff] }
  0x4e   : > { %1343 = vmatmul.msk.bf16.vlgmr.msra.gmra.mxu2 %vm622_vm0, %v1889_v4 }
  0x50   : > { %633 = vmatpush.bf16.msra.mxu0 %v1386_v2 }
  0x53   : > { %1325 = vmatmul.msk.bf16.vlgmr.msra.gmra.mxu0 %vm622_vm0, %v1889_v4 }
  0xca   : > { %v668_v8 = vpop.f32.mrf.mxu1 }
  0xcb   : > { %v669_v10 = vadd.f32 %v1472_v6, %v668_v8 }
  0xcd   : > { %v706_v11 = vpack.c.bf16 %v669_v10, %v669_v10 }
  0xcf   : > { %v772_v13 = vunpack.c.l.b16 %v706_v11  ;;  %v717_v14 = vsel %vm712_vm1, %v706_v11, 0 }
  0xd0   : > { %v635_v7 = vpop.f32.mrf.mxu0  ;;  %726 = vmatpush.bf16.xpose.msra.mxu3 %v717_v14 }
  0xd1   : > { %v636_v9 = vadd.f32 %v1471_v5, %v635_v7  ;;  %v773_v15 = vpack.c.b16 %v772_v13, %v772_v13  ;;  %v701_v45 = vpop.f32.mrf.mxu2 }
  0xd2   : > { %v670_v17 = vpop.f32.mrf.mxu1  ;;  %v702_v48 = vadd.f32 %v1473_v46, %v701_v45 }
  0xd3   : > { %v705_v12 = vpack.c.bf16 %v636_v9, %v636_v9  ;;  %873 = vrot.lane.b32.xlu2 %v773_v15, %s1669_s7  ;;  %774 = vrot.lane.b32.xlu1 %v773_v15, %s1670_s16 }
  0xd4   : > { %v707_v49 = vpack.c.bf16 %v702_v48, %v702_v48 }
  0xd5   : > { %v767_v18 = vunpack.c.l.b16 %v705_v12 }
  0xd6   : > { %v750_v50 = vsel %vm748_vm2, %v707_v49, 0  ;;  %v809_v5 = vunpack.c.l.b16 %v707_v49 }
  0xd7   : > { %v768_v19 = vpack.c.b16 %v767_v18, %v767_v18  ;;  %1344 = vmatmul.msk.bf16.vlgmr.msra.gmra.mxu3 %vm712_vm1, %v705_v12  ;;  %759 = vmatpush.bf16.msrb.mxu0 %v750_v50 }
  0xd8   : > { %v637_v16 = vpop.f32.mrf.mxu0  ;;  %v810_v7 = vpack.c.b16 %v809_v5, %v809_v5 }
  0xd9   : > { %v703_v47 = vpop.f32.mrf.mxu2 }
  0xdb   : > { %871 = vrot.lane.b32.xlu2 %v768_v19, %s1669_s7  ;;  %769 = vrot.lane.b32.xlu1 %v768_v19, %s1670_s16 }
  0xdc   : > { %865 = vmatpush.bf16.msra.mxu0 %v856_v54 }
  0xe3   : > { %949 = vrot.lane.b32.xlu1 %v768_v19, %s1671_s26 }
 0x12d   : > { %v874_v21 = vpop.permute.xlu2 %873 }
 0x12e   : > { %v879_v25 = vsel %vm712_vm1, %v874_v21, 0 }
 0x135   : > { %v872_v29 = vpop.permute.xlu2 %871 }
 0x145   : > { %v775_v23 = vpop.permute.xlu1 %774 }
 0x146   : > { %v780_v24 = vsel %vm712_vm1, %v775_v23, 0 }
 0x147   : > { %789 = vmatpush.bf16.xpose.msrb.mxu1 %v780_v24  ;;  %v709_v24 = vld [vmem:[#allocation5 + $0x4] sm:$0xf] }
 0x14d   : > { %v770_v26 = vpop.permute.xlu1 %769 }
 0x14e   : > { %1346 = vmatmul.msk.bf16.vlgmr.msrb.gmra.mxu1 %vm712_vm1, %v770_v26  ;;  %v710_v26 = vld [vmem:[#allocation5 + $0x8] sm:$0xf] }
 0x14f   : > { %888 = vmatpush.bf16.xpose.msra.mxu1 %v879_v25  ;;  %v837_v25 = vsel %vm748_vm2, %v709_v24, 0 }
 0x150   : > { %846 = vmatpush.bf16.msrb.mxu3 %v837_v25 }
 0x155   : > { %v950_v56 = vpop.permute.xlu1 %949 }
 0x15a   : > { %v728_v27 = vpop.f32.mrf.mxu3 }
 0x15b   : > { %v732_v28 = vmul.f32 0.35355338, %v728_v27  ;;  %v933_v27 = vsel %vm748_vm2, %v710_v26, 0 }
 0x15c   : > { %942 = vmatpush.bf16.msra.mxu3 %v933_v27 }
 0x15d   : > { %v733_v30 = vsel %vm712_vm1, %v732_v28, -inf }
 0x15e   : > { %1350 = vmatmul.msk.bf16.vlgmr.msra.gmra.mxu1 %vm712_vm1, %v872_v29  ;;  %734 = vmax.xlane.f32.xlu0 %v733_v30 }
 0x162   : > { %v730_v31 = vpop.f32.mrf.mxu3 }
 0x1cb   : > { %v791_v32 = vpop.f32.mrf.mxu1 }
 0x1cc   : > { %v795_v33 = vmul.f32 0.35355338, %v791_v32 }
 0x1ce   : > { %v796_v34 = vsel %vm712_vm1, %v795_v33, -inf }
 0x1cf   : > { %797 = vmax.xlane.f32.xlu2 %v796_v34 }
 0x1d1   : > { %v735_v35 = vpop.xlane.xlu0 %734 }
 0x1d2   : > { %v736_v36 = vsub.f32 %v732_v28, %v735_v35 }
 0x1d3   : > { %v793_v37 = vpop.f32.mrf.mxu1 }
 0x1d4   : > { %v737_v38 = vmul.f32 1.442695, %v736_v36 }
 0x1d6   : > { %1481 = vpow2.f32 %v737_v38 }
 0x1db   : > { %v890_v39 = vpop.f32.mrf.mxu1 }
 0x1dc   : > { %v1482_v40 = vpop.eup %1481  ;;  %v894_v41 = vmul.f32 0.35355338, %v890_v39 }
 0x1dd   : > { %v739_v42 = vsel %vm712_vm1, %v1482_v40, 0.0 }
 0x1de   : > { %740 = vadd.xlane.f32.xlu0 %v739_v42  ;;  %v895_v43 = vsel %vm712_vm1, %v894_v41, -inf }
 0x1df   : > { %896 = vmax.xlane.f32.xlu1 %v895_v43 }
 0x1e3   : > { %v892_v44 = vpop.f32.mrf.mxu1 }
 0x1f2   : > { %951 = vrot.lane.b32.xlu0 %v773_v15, %s1671_s26 }
 0x242   : > { %v798_v51 = vpop.xlane.xlu2 %797 }
 0x243   : > { %v799_v52 = vsub.f32 %v795_v33, %v798_v51 }
 0x245   : > { %v800_v55 = vmul.f32 1.442695, %v799_v52 }
 0x247   : > { %1483 = vpow2.f32 %v800_v55 }
 0x24d   : > { %v1484_v57 = vpop.eup %1483 }
 0x24e   : > { %v802_v58 = vsel %vm712_vm1, %v1484_v57, 0.0 }
 0x24f   : > { %803 = vadd.xlane.f32.xlu2 %v802_v58 }
 0x251   : > { %v741_v59 = vpop.xlane.xlu0 %740 }
 0x252   : > { %1485 = vrcp.f32 %v741_v59  ;;  %v897_v60 = vpop.xlane.xlu1 %896 }
 0x253   : > { %v898_v61 = vsub.f32 %v894_v41, %v897_v60 }
 0x255   : > { %v899_v62 = vmul.f32 1.442695, %v898_v61 }
 0x257   : > { %1487 = vpow2.f32 %v899_v62  ;;  %v1474_v62 = vld [vmem:[%s2035_s8] ss:$0 sm:$0xff] }
 0x258   : > { %v1486_v63 = vpop.eup %1485 }
 0x259   : > { %v743_v0 = vmul.f32 %v1486_v63, %v1482_v40 }
 0x25b   : > { %v744_v1 = vpack.c.bf16 %v743_v0, %v743_v0 }
 0x25d   : > { %v1488_v2 = vpop.eup %1487  ;;  %1345 = vmatmul.msk.bf16.vlgmr.msrb.gmra.mxu0 %vm712_vm1, %v744_v1  ;;  %v601_v1 = vunpack.c.l.bf16 %v1889_v4 }
 0x25e   : > { %v901_v3 = vsel %vm712_vm1, %v1488_v2, 0.0 }
 0x25f   : > { %902 = vadd.xlane.f32.xlu1 %v901_v3 }
 0x264   : > { %v952_v6 = vpop.permute.xlu0 %951 }
 0x265   : > { %v957_v8 = vsel %vm712_vm1, %v952_v6, 0 }
 0x266   : > { %966 = vmatpush.bf16.xpose.msrb.mxu0 %v957_v8 }
 0x267   : > { %811 = vrot.lane.b32.xlu2 %v810_v7, %s1670_s16  ;;  %s1383_s16 = sshll.u32 %s1787_s30, 2  ;;  %s598_s30 = scalar_lea.vmem [#allocation8], %s1313_s29 }
 0x268   : > { %s1211_s19 = scalar_lea.hbm %s2083_s17, %s1383_s16  ;;  %s1613_s29 = scalar_lea.hbm %s2083_s17, 8 }
 0x269   : > { %s1215_s2 = sshll.u32 %s1211_s19, 4  ;;  %s1216_s2 = int_to_ptr.hbm [resolvable:$true] %s1215_s2 }
 0x26a   : > { %s1607_s9 = sshra.s32 %s1216_s2, 4  ;;  %s1608_s9 = int_to_ptr.hbm [resolvable:$true] %s1607_s9 }
 0x26b   : > { %p1614_p12 = scmp.lt.s32.totalorder %s1608_s9, %s2083_s17 }
 0x278   : > { %907 = vrot.lane.b32.xlu1 %v810_v7, %s1669_s7  ;;  %s1213_s7 = sshll.u32 %s598_s30, 4  ;;  %s1214_s7 = int_to_ptr.vmem [resolvable:$true] %s1213_s7 }
 0x2c2   : > { %v804_v9 = vpop.xlane.xlu2 %803 }
 0x2c3   : > { %1489 = vrcp.f32 %v804_v9 }
 0x2c9   : > { %v1490_v10 = vpop.eup %1489 }
 0x2ca   : > { %v806_v11 = vmul.f32 %v1490_v10, %v1484_v57  ;;  %v812_v12 = vpop.permute.xlu2 %811  ;;  %v711_v57 = vld [vmem:[#allocation5 + $0xc] sm:$0xf] }
 0x2cb   : > { %v817_v13 = vsel %vm748_vm2, %v812_v12, 0  ;;  %v1011_v58 = vsel %vm748_vm2, %v711_v57, 0 }
 0x2cc   : > { %826 = vmatpush.bf16.msrb.mxu2 %v817_v13  ;;  %v807_v14 = vpack.c.bf16 %v806_v11, %v806_v11 }
 0x2cf   : > { %1347 = vmatmul.msk.bf16.vlgmr.msrb.gmra.mxu2 %vm712_vm1, %v807_v14 }
 0x2d2   : > { %v903_v17 = vpop.xlane.xlu1 %902 }
 0x2d3   : > { %1491 = vrcp.f32 %v903_v17 }
 0x2d9   : > { %v1492_v19 = vpop.eup %1491 }
 0x2da   : > { %v761_v15 = vpop.f32.mrf.mxu0  ;;  %v905_v20 = vmul.f32 %v1492_v19, %v1488_v2  ;;  %v1392_v19 = vld [vmem:[#allocation7] sm:$0xff] }
 0x2db   : > { %v765_v16 = vpack.c.bf16 %v761_v15, %v761_v15 }
 0x2dc   : > { %v906_v23 = vpack.c.bf16 %v905_v20, %v905_v20  ;;  %v1397_v20 = vld [vmem:[%s2038_s11 + $0x18] sm:$0xff] }
 0x2dd   : > { %1349 = vmatmul.msk.bf16.vlgmr.msra.gmra.mxu0 %vm712_vm1, %v765_v16 }
 0x2de   : > { %1155 = vmatpush.bf16.msra.mxu0 %v1397_v20 }
 0x2e2   : > { %v763_v18 = vpop.f32.mrf.mxu0 }
 0x2e3   : > { %v1393_v18 = vld [vmem:[#allocation7 + $0x8] sm:$0xff] }
 0x2ea   : > { %v908_v21 = vpop.permute.xlu1 %907 }
 0x2eb   : > { %v913_v22 = vsel %vm748_vm2, %v908_v21, 0 }
 0x2ec   : > { %922 = vmatpush.bf16.msra.mxu2 %v913_v22 }
 0x2ed   : > { %1353 = vmatmul.msk.bf16.vlgmr.msrb.gmra.mxu0 %vm712_vm1, %v950_v56 }
 0x2ef   : > { %1351 = vmatmul.msk.bf16.vlgmr.msra.gmra.mxu2 %vm712_vm1, %v906_v23  ;;  %v1396_v23 = vld [vmem:[%s2038_s11 + $0x10] sm:$0xff] }
 0x2f0   : > { %1020 = vmatpush.bf16.msrb.mxu2 %v1011_v58  ;;  %1156 = vmatpush.bf16.msra.mxu0 %v1396_v23 }
 0x352   : > { %v828_v28 = vpop.f32.mrf.mxu2 }
 0x353   : > { %v832_v29 = vpack.c.bf16 %v828_v28, %v828_v28 }
 0x355   : > { %1348 = vmatmul.msk.bf16.vlgmr.msrb.gmra.mxu3 %vm712_vm1, %v832_v29 }
 0x356   : > { %1102 = vmatpush.bf16.msrb.mxu3 %v1393_v18 }
 0x35a   : > { %v830_v30 = vpop.f32.mrf.mxu2  ;;  %v867_v31 = vpop.f32.mrf.mxu0  ;;  %1103 = vmatpush.bf16.msrb.mxu3 %v1392_v19 }
 0x362   : > { %v869_v32 = vpop.f32.mrf.mxu0 }
 0x36a   : > { %v968_v33 = vpop.f32.mrf.mxu0 }
 0x36b   : > { %v972_v34 = vmul.f32 0.35355338, %v968_v33  ;;  %v1476_v33 = vld [vmem:[%s2041_s14] ss:$0 sm:$0xff] }
 0x36d   : > { %v973_v35 = vsel %vm712_vm1, %v972_v34, -inf }
 0x36e   : > { %974 = vmax.xlane.f32.xlu0 %v973_v35 }
 0x372   : > { %v924_v36 = vpop.f32.mrf.mxu2  ;;  %v970_v37 = vpop.f32.mrf.mxu0 }
 0x373   : > { %v928_v38 = vpack.c.bf16 %v924_v36, %v924_v36 }
 0x375   : > { %1352 = vmatmul.msk.bf16.vlgmr.msra.gmra.mxu3 %vm712_vm1, %v928_v38  ;;  %v1395_v38 = vld [vmem:[%s2038_s11 + $0x8] sm:$0xff] }
 0x376   : > { %1157 = vmatpush.bf16.msra.mxu0 %v1395_v38 }
 0x37a   : > { %v926_v39 = vpop.f32.mrf.mxu2 }
 0x37b   : > { %v1394_v39 = vld [vmem:[%s2038_s11] sm:$0xff] }
 0x37c   : > { %1158 = vmatpush.bf16.msra.mxu0 %v1394_v39 }
 0x3d8   : > { %v848_v40 = vpop.f32.mrf.mxu3 }
 0x3d9   : > { %v868_v47 = vadd.f32 %v867_v31, %v848_v40  ;;  %v1475_v31 = vld [vmem:[%s2040_s13] ss:$0 sm:$0xff] }
 0x3da   : > { %v1477_v40 = vld [vmem:[%s2037_s10] ss:$0 sm:$0xff] }
 0x3e0   : > { %v850_v41 = vpop.f32.mrf.mxu3 }
 0x3e1   : > { %v975_v42 = vpop.xlane.xlu0 %974 }
 0x3e2   : > { %v976_v43 = vsub.f32 %v972_v34, %v975_v42 }
 0x3e4   : > { %v977_v44 = vmul.f32 1.442695, %v976_v43 }
 0x3e6   : > { %1493 = vpow2.f32 %v977_v44 }
 0x3ec   : > { %v1494_v45 = vpop.eup %1493 }
 0x3ed   : > { %v979_v46 = vsel %vm712_vm1, %v1494_v45, 0.0 }
 0x3ee   : > { %980 = vadd.xlane.f32.xlu0 %v979_v46  ;;  %v1478_v46 = vld [vmem:[%s2039_s12] ss:$0 sm:$0xff] }
 0x3f8   : > { %v944_v48 = vpop.f32.mrf.mxu3 }
 0x3f9   : > { %v948_v49 = vadd.f32 %v944_v48, %v868_v47 }
 0x400   : > { %v946_v50 = vpop.f32.mrf.mxu3 }
 0x402   : > { %985 = vrot.lane.b32.xlu0 %v810_v7, %s1671_s26  ;;  %v1672_v7 = vmov 32.0   ;;  %s1201_s26 = scalar_lea.sflag [#allocation4], %s1863_s1 }
 0x461   : > { %v981_v51 = vpop.xlane.xlu0 %980 }
 0x462   : > { %1495 = vrcp.f32 %v981_v51 }
 0x463   : > { %1497 = vrcp.f32 %v1672_v7 }
 0x468   : > { %v1496_v52 = vpop.eup %1495 }
 0x469   : > { %v983_v53 = vmul.f32 %v1496_v52, %v1494_v45  ;;  %v1498_v8 = vpop.eup %1497 }
 0x46a   : > { %v1037_v9 = vmul.f32 32.0, %v1498_v8  ;;  %vm1041_vm3 = vweird.f32 %v1498_v8 }
 0x46b   : > { %v984_v56 = vpack.c.bf16 %v983_v53, %v983_v53 }
 0x46c   : > { %v1038_v10 = vsub.f32 1.0, %v1037_v9 }
 0x46e   : > { %v1039_v11 = vmul.f32 %v1498_v8, %v1038_v10 }
 0x470   : > { %v1040_v12 = vadd.f32 %v1498_v8, %v1039_v11 }
 0x472   : > { %v1042_v13 = vsel %vm1041_vm3, %v1498_v8, %v1040_v12 }
 0x474   : > { %v986_v54 = vpop.permute.xlu0 %985 }
 0x475   : > { %v991_v55 = vsel %vm748_vm2, %v986_v54, 0 }
 0x476   : > { %1000 = vmatpush.bf16.msrb.mxu1 %v991_v55 }
 0x479   : > { %1354 = vmatmul.msk.bf16.vlgmr.msrb.gmra.mxu1 %vm712_vm1, %v984_v56 }
 0x4f6   : > { %v1002_v59 = vpop.f32.mrf.mxu1 }
 0x4f7   : > { %v1006_v60 = vpack.c.bf16 %v1002_v59, %v1002_v59 }
 0x4f9   : > { %1355 = vmatmul.msk.bf16.vlgmr.msrb.gmra.mxu2 %vm712_vm1, %v1006_v60 }
 0x4fe   : > { %v1004_v61 = vpop.f32.mrf.mxu1 }
 0x57c   : > { %v1022_v63 = vpop.f32.mrf.mxu2 }
 0x57d   : > { %v1026_v0 = vadd.f32 %v1022_v63, %v948_v49 }
 0x57f   : > { %v1031_v2 = vadd.f32 %v1474_v62, %v1026_v0 }
 0x581   : > { %v1032_v3 = vadd.f32 %v1031_v2, %v601_v1  ;;  %v1479_v2 = vld [vmem:[%s2081_s20] ss:$0 sm:$0xff]  ;;  %s1609_s20 = scalar_lea.hbm %s1608_s9, 4 }
 0x582   : > { %p1610_p1 = scmp.ne.s32.totalorder %s1608_s9, %s1609_s20  ;;  %p1615_p7 = scmp.lt.s32.totalorder %s1613_s29, %s1609_s20 }
 0x583   : > { %v1033_v5 = vsel %vm622_vm0, %v1032_v3, 0.0 }
 0x584   : > { %v1024_v6 = vpop.f32.mrf.mxu2  ;;  %1034 = vadd.xlane.f32.xlu2 %v1033_v5  ;;  %v1480_v5 = vld [vmem:[%s2082_s0] ss:$0 sm:$0xff]  ;;  %p1611_p3 = pnand %p1610_p1, %p1832_p4  ;;  %p1616_p8 = por %p1615_p7, %p1614_p12 }
 0x586   : > { %p1612_p5 = pneg %p1611_p3 }
 0x588   : > { %p1617_p9 = pnand %p1616_p8, %p1612_p5 }
 0x5f7   : > { %v1035_v14 = vpop.xlane.xlu2 %1034 }
 0x5f8   : > { %v1043_v15 = vmul.f32 %v1042_v13, %v1035_v14 }
 0x5fa   : > { %v1044_v16 = vsub.f32 %v1032_v3, %v1043_v15 }
 0x5fc   : > { %v1045_v17 = vmul.f32 %v1044_v16, %v1044_v16 }
 0x5fe   : > { %v1046_v4 = vsel %vm622_vm0, %v1045_v17, 0.0 }
 0x5ff   : > { %1047 = vadd.xlane.f32.xlu1 %v1046_v4 }
 0x672   : > { %v1048_v21 = vpop.xlane.xlu1 %1047 }
 0x673   : > { %v1049_v22 = vmul.f32 %v1048_v21, %v1042_v13 }
 0x675   : > { %v1050_v24 = vadd.f32 1e-05, %v1049_v22 }
 0x677   : > { %1499 = vrsqrt.f32 %v1050_v24  ;;  %vm1057_vm5 = vweird.f32 %v1050_v24 }
 0x67d   : > { %v1500_v25 = vpop.eup %1499 }
 0x67e   : > { %v1052_v26 = vmul.f32 %v1500_v25, %v1050_v24  ;;  %vm1058_vm4 = vweird.f32 %v1500_v25 }
 0x67f   : > { %vm1059_vm6 = vmor %vm1057_vm5, %vm1058_vm4 }
 0x680   : > { %v1053_v27 = vmul.f32 %v1500_v25, %v1052_v26 }
 0x682   : > { %v1054_v28 = vmul.f32 0.5, %v1053_v27 }
 0x684   : > { %v1055_v29 = vsub.f32 1.5, %v1054_v28 }
 0x686   : > { %v1056_v30 = vmul.f32 %v1500_v25, %v1055_v29 }
 0x688   : > { %v1060_v32 = vsel %vm1059_vm6, %v1500_v25, %v1056_v30 }
 0x689   : > { %v1061_v34 = vmul.f32 %v1060_v32, %v1044_v16 }
 0x68b   : > { %v1066_v35 = vmul.f32 %v1475_v31, %v1061_v34 }
 0x68d   : > { %v1071_v36 = vadd.f32 %v1476_v33, %v1066_v35 }
 0x68f   : > { %v1072_v37 = vpack.c.bf16 %v1071_v36, %v1071_v36 }
 0x691   : > { %1364 = vmatmul.msk.bf16.vlgmr.msrb.gmra.mxu3 %vm622_vm0, %v1072_v37 }
 0x714   : > { %v1105_v41 = vpop.f32.mrf.mxu3 }
 0x715   : > { %v1106_v42 = vadd.f32 %v1477_v40, %v1105_v41 }
 0x717   : > { %v1109_v43 = vmax.f32 %v1106_v42, 0.0 }
 0x719   : > { %v1110_v44 = vpack.c.bf16 %v1109_v43, %v1109_v43 }
 0x71b   : > { %1381 = vmatmul.msk.bf16.vlgmr.msra.gmra.mxu0 %vm1147_vm7, %v1110_v44 }
 0x71c   : > { %v1107_v45 = vpop.f32.mrf.mxu3 }
 0x798   : > { %v1160_v47 = vpop.f32.mrf.mxu0 }
 0x799   : > { %v1161_v48 = vadd.f32 %v1478_v46, %v1160_v47 }
 0x79b   : > { %v1164_v49 = vadd.f32 %v1161_v48, %v1071_v36 }
 0x79d   : > { %v1165_v50 = vsel %vm622_vm0, %v1164_v49, 0.0 }
 0x79e   : > { %1166 = vadd.xlane.f32.xlu0 %v1165_v50 }
 0x7a0   : > { %v1162_v51 = vpop.f32.mrf.mxu0 }
 0x811   : > { %v1167_v52 = vpop.xlane.xlu0 %1166 }
 0x812   : > { %v1168_v53 = vmul.f32 %v1167_v52, %v1042_v13 }
 0x814   : > { %v1169_v54 = vsub.f32 %v1164_v49, %v1168_v53 }
 0x816   : > { %v1170_v55 = vmul.f32 %v1169_v54, %v1169_v54 }
 0x818   : > { %v1171_v56 = vsel %vm622_vm0, %v1170_v55, 0.0 }
 0x819   : > { %1172 = vadd.xlane.f32.xlu2 %v1171_v56 }
 0x88c   : > { %v1173_v57 = vpop.xlane.xlu2 %1172 }
 0x88d   : > { %v1174_v58 = vmul.f32 %v1173_v57, %v1042_v13 }
 0x88f   : > { %v1175_v59 = vadd.f32 1e-05, %v1174_v58 }
 0x891   : > { %1501 = vrsqrt.f32 %v1175_v59  ;;  %vm1182_vm9 = vweird.f32 %v1175_v59 }
 0x897   : > { %v1502_v60 = vpop.eup %1501 }
 0x898   : > { %v1177_v61 = vmul.f32 %v1502_v60, %v1175_v59  ;;  %vm1183_vm8 = vweird.f32 %v1502_v60 }
 0x899   : > { %vm1184_vm10 = vmor %vm1182_vm9, %vm1183_vm8 }
 0x89a   : > { %v1178_v62 = vmul.f32 %v1502_v60, %v1177_v61 }
 0x89c   : > { %v1179_v63 = vmul.f32 0.5, %v1178_v62 }
 0x89e   : > { %v1180_v0 = vsub.f32 1.5, %v1179_v63 }
 0x8a0   : > { %v1181_v1 = vmul.f32 %v1502_v60, %v1180_v0 }
 0x8a2   : > { %v1185_v3 = vsel %vm1184_vm10, %v1502_v60, %v1181_v1 }
 0x8a3   : > { %v1186_v6 = vmul.f32 %v1185_v3, %v1169_v54 }
 0x8a5   : > { %v1191_v7 = vmul.f32 %v1479_v2, %v1186_v6 }
 0x8a7   : > { %v1196_v8 = vadd.f32 %v1480_v5, %v1191_v7 }
 0x8a9   : > { %v1197_v9 = vpack.c.bf16 %v1196_v8, %v1196_v8 }
 0x8ab   : > { %1199 = vst.msk [vmem:[%s598_s30] sm:$0xf] %vm1198_vm11, %v1197_v9 }
 0x8ac   : > { %1620 = shalt.err (!%p1617_p9)
}
 0x8ad   : > { %1408 = dma.vmem_to_hbm [thread:$0]  (%p1832_p4), %s1214_s7, 64, %s1216_s2, %s1201_s26  }
 0x8ae PF: > { %s2085_s1 = sld [smem:[#allocation12_spill]]  ;;  %p2087_p10 = scmp.ge.s32.totalorder %s1663_s27, 2 }
 0x8b0   : > { %p1422_p13 = pnand %p2087_p10, %p1836_p6 }
 0x8b2   : > { %p1423_p11 = pneg %p1422_p13 }
 0x8b4   : > { %s1227_s28 = sand.u32 1, %s2085_s1  }
 0x8b5   : > { %s1228_s19 = scalar_lea.sflag [#allocation4], %s1227_s28 }
 0x8b6   : > { %1646 = dma.done.wait (%p1423_p11), %s1228_s19, 64  }
 0x8b7   : > { %1648 = vsyncadd (%p1423_p11), %s1228_s19, 4294967232  ;;  %s2088_s27 = sld [smem:[#allocation14_spill]]  ;;  %s2091_s24 = smov %s1655_s25 }
 0x8b8   : > { %s2089_s30 = sld [smem:[#allocation13_spill]] }
 0x8b9   : > { %s2090_s26 = sld [smem:[#allocation15_spill]] }
 0x8bd   : > { %p31_p0 = scmp.ge.s32.totalorder %s2088_s27, 4  }
 0x8be   : > { %s2092_s25 = smov %s2089_s30 }
 0x8bf   :  { %33 = sbr.rel (!%p31_p0) target bundleno = 15 (0xf), region = 141 }
 0x8c4   :  { %1234 = vsyncpa [#allocation3], 1 }
 0x8c5   :  { %1236 = vsyncpa [#allocation3 + $0x1], 1 }
 0x8c6   :  { %1237 = vsyncpa [#allocation6], 1 }
 0x8c7   :  { %1238 = vsyncpa [#allocation4], 1 }
 0x8c8   :  { %1240 = vsyncpa [#allocation4 + $0x1], 1 }

// kernel: tpu_custom_call.1
= control target key start
LH: loop header
LB: loop body
LE: loop exit
PB: predicated region body
PF: predicated region fallthrough
CT: control target
= control target key end

     0   :  { %s2027_s0 = inlined_call_operand.hbm [shape: bf16[16,32], index: 0, kind: input, shape index: {}]   ;;  %s2028_s1 = inlined_call_operand.vmem [shape: bf16[32,32], index: 1, kind: input, shape index: {}]   ;;  %s2029_s2 = inlined_call_operand.vmem [shape: f32[1,32], index: 2, kind: input, shape index: {}]   ;;  %s2030_s3 = inlined_call_operand.vmem [shape: bf16[32,32], index: 3, kind: input, shape index: {}]   ;;  %s2031_s4 = inlined_call_operand.vmem [shape: f32[1,32], index: 4, kind: input, shape index: {}]   ;;  %s2032_s5 = inlined_call_operand.vmem [shape: bf16[32,32], index: 5, kind: input, shape index: {}]   ;;  %s2033_s6 = inlined_call_operand.vmem [shape: f32[1,32], index: 6, kind: input, shape index: {}]   ;;  %s2034_s7 = inlined_call_operand.hbm [shape: bf16[32,32], index: 7, kind: input, shape index: {}]   ;;  %s2035_s8 = inlined_call_operand.vmem [shape: f32[1,32], index: 8, kind: input, shape index: {}]   ;;  %s2036_s9 = inlined_call_operand.hbm [shape: bf16[32,64], index: 9, kind: input, shape index: {}]   ;;  %s2037_s10 = inlined_call_operand.vmem [shape: f32[1,64], index: 10, kind: input, shape index: {}]   ;;  %s2038_s11 = inlined_call_operand.vmem [shape: bf16[64,32], index: 11, kind: input, shape index: {}]   ;;  %s2039_s12 = inlined_call_operand.vmem [shape: f32[1,32], index: 12, kind: input, shape index: {}]   ;;  %s2040_s13 = inlined_call_operand.vmem [shape: f32[1,32], index: 13, kind: input, shape index: {}]   ;;  %s2041_s14 = inlined_call_operand.vmem [shape: f32[1,32], index: 14, kind: input, shape index: {}]   ;;  %s2042_s15 = inlined_call_operand.vmem [shape: f32[1,32], index: 15, kind: input, shape index: {}]   ;;  %s2043_s16 = inlined_call_operand.vmem [shape: f32[1,32], index: 16, kind: input, shape index: {}]   ;;  %s2044_s17 = inlined_call_operand.hbm [shape: bf16[16,32], index: 17, kind: output, shape index: {}]  }
   0x1   :  { %2055 = sst [smem:[#allocation18_spill]] %s2027_s0 }
   0x2   :  { %2056 = sst [smem:[#allocation19_spill]] %s2028_s1 }
   0x3   :  { %2057 = sst [smem:[#allocation20_spill]] %s2029_s2 }
   0x4   :  { %2058 = sst [smem:[#allocation21_spill]] %s2034_s7 }
   0x5   :  { %2059 = sst [smem:[#allocation22_spill]] %s2036_s9 }
   0x6   :  { %2060 = sst [smem:[#allocation23_spill]] %s2042_s15 }
   0x7   :  { %2061 = sst [smem:[#allocation24_spill]] %s2043_s16 }
   0x8   :  { %2062 = sst [smem:[#allocation25_spill]] %s2044_s17 }
   0x9   :  { %22 = vsyncpa [#allocation3], 0 }
   0xa   :  { %24 = vsyncpa [#allocation3 + $0x1], 0 }
   0xb   :  { %25 = vsyncpa [#allocation6], 0 }
   0xc   :  { %26 = vsyncpa [#allocation4], 0 }
   0xd   :  { %28 = vsyncpa [#allocation4 + $0x1], 0  ;;  %s1763_s24 = smov 0   ;;  %s1765_s25 = smov 0  }
   0xe   :  { %s1767_s26 = smov 0   ;;  %s1769_s27 = smov 0  }
   0xf LB: > { %2063 = sst [smem:[#allocation12_spill]] %s1651_s24  ;;  %s1787_s30 = sadd.s32 4294967295, %s1663_s27   ;;  %s1663_s27 = sphi %s1769_s27, %s2088_s27   ;;  %s1659_s26 = sphi %s1767_s26, %s2090_s26   ;;  %s1655_s25 = sphi %s1765_s25, %s2092_s25   ;;  %s1651_s24 = sphi %s1763_s24, %s2091_s24  }
  0x10   : > { %2064 = sst [smem:[#allocation13_spill]] %s1659_s26  ;;  %p1306_p0 = scmp.ge.s32.totalorder %s1663_s27, 1 }
  0x11   : > { %s2065_s7 = sld [smem:[#allocation21_spill]]  ;;  %p55_p1 = scmp.eq.s32.totalorder %s1787_s30, 0 }
  0x12   : > { %p427_p2 = scmp.lt.s32.totalorder %s1663_s27, 3  ;;  %s1665_s19 = smov [#allocation5]  }
  0x13   : > { %s458_s1 = sshll.u32 %s1665_s19, 4  ;;  %s2067_s9 = sld [smem:[#allocation22_spill]]  ;;  %s459_s1 = int_to_ptr.vmem [resolvable:$true] %s458_s1 }
  0x14   : > { %p1792_p3 = pnand %p1306_p0, %p427_p2  ;;  %s1666_s23 = smov [#allocation7]  }
  0x15   : > { %s475_s28 = sshll.u32 %s1666_s23, 4  ;;  %s1667_s29 = smov 64   ;;  %s476_s28 = int_to_ptr.vmem [resolvable:$true] %s475_s28 }
  0x16   : > { %p1410_p4 = pneg %p1792_p3  ;;  %s1668_s19 = smov 4  }
  0x17   : > { %s456_s0 = sshll.u32 %s2065_s7, 4  ;;  %s1305_s20 = sadd.s32 4294967294, %s1663_s27   ;;  %s457_s0 = int_to_ptr.hbm [resolvable:$true] %s456_s0 }
  0x18   : > { %p1411_p6 = pnand %p1410_p4, %p55_p1  ;;  %s1806_s21 = sadd.s32 1, %s1663_s27  }
  0x19   : > { %s473_s22 = sshll.u32 %s2067_s9, 4  ;;  %2068 = sst [smem:[#allocation14_spill]] %s1806_s21  ;;  %s474_s22 = int_to_ptr.hbm [resolvable:$true] %s473_s22 }
  0x1a   : > { %1413 = dma.hbm_to_vmem [thread:$0]  (!%p1411_p6), %s457_s0, 256, %s459_s1, [#allocation6], %s1667_s29, %s1667_s29, %s1668_s19  }
  0x1b   : > { %1416 = dma.hbm_to_vmem [thread:$0]  (!%p1411_p6), %s474_s22, 256, %s476_s28, [#allocation6], %s1667_s29, %s1667_s29, %s1668_s19  }
  0x1c   : > { %s38_s7 = ssub.s32 %s1663_s27, %s1806_s21  ;;  %s41_s9 = sadd.s32 1, %s1659_s26 }
  0x1d   : > { %p39_p7 = scmp.eq.s32.totalorder %s38_s7, 0  ;;  %p48_p8 = scmp.ne.s32.totalorder %s1659_s26, %s1655_s25 }
  0x1e   : > { %p49_p9 = scmp.eq.s32.totalorder %s1663_s27, 0  ;;  %p54_p10 = scmp.ne.s32.totalorder %s1655_s25, %s1651_s24 }
  0x1f   : > { %s1817_s23 = scalar_select %p39_p7, %s1659_s26, %s41_s9  }
  0x20   : > { %p1819_p11 = por %p49_p9, %p48_p8  ;;  %p1825_p12 = por %p55_p1, %p54_p10 }
  0x21   : > { %2069 = sst [smem:[#allocation15_spill]] %s1817_s23  ;;  %p414_p13 = scmp.eq.s32.totalorder %s1787_s30, 1 }
  0x22   : > { %p420_p0 = scmp.eq.s32.totalorder %s1305_s20, 1  ;;  %p1427_p2 = scmp.lt.s32.totalorder %s1663_s27, 2 }
  0x23   : > { %s510_s1 = sand.u32 1, %s1659_s26   ;;  %p1832_p4 = por %p414_p13, %p48_p8 }
  0x24   : > { %p1836_p6 = por %p420_p0, %p54_p10  ;;  %s1310_s22 = sshll.u32 %s510_s1, 2 }
  0x25   : > { %s2072_s7 = scalar_select %p1832_p4, 1, 0 }
  0x26   : > { %s2074_s9 = scalar_select %p1836_p6, 1, 0 }
  0x27   : > { %2073 = sst [smem:[#allocation16_spill]] %s2072_s7  ;;  %s1311_s28 = sshll.u32 %s1663_s27, 2 }
  0x28   : > { %2075 = sst [smem:[#allocation17_spill]] %s2074_s9  ;;  %s514_s24 = scalar_lea.vmem [#allocation2], %s1310_s22 }
  0x29   : > { %s2076_s23 = sld [smem:[#allocation18_spill]]  ;;  %s522_s16 = sshll.u32 %s514_s24, 4  ;;  %s523_s16 = int_to_ptr.vmem [resolvable:$true] %s522_s16 }
  0x2a   : > { %p1846_p7 = pnand %p1427_p2, %p1819_p11  ;;  %s511_s26 = scalar_lea.sflag [#allocation3], %s510_s1 }
  0x2c   : > { %p1567_p9 = pneg %p1846_p7 }
  0x2f   : > { %s518_s21 = scalar_lea.hbm %s2076_s23, %s1311_s28 }
  0x30   : > { %s520_s15 = sshll.u32 %s518_s21, 4  ;;  %s1570_s21 = scalar_lea.hbm %s2076_s23, 8  ;;  %s521_s15 = int_to_ptr.hbm [resolvable:$true] %s520_s15 }
  0x31   : > { %s1563_s7 = sshra.s32 %s521_s15, 4  ;;  %s1564_s7 = int_to_ptr.hbm [resolvable:$true] %s1563_s7 }
  0x32   : > { %s1565_s9 = scalar_lea.hbm %s1564_s7, 4  ;;  %p1571_p11 = scmp.lt.s32.totalorder %s1564_s7, %s2076_s23 }
  0x33   : > { %p1566_p8 = scmp.ne.s32.totalorder %s1564_s7, %s1565_s9  ;;  %p1572_p0 = scmp.lt.s32.totalorder %s1570_s21, %s1565_s9 }
  0x35   : > { %p1568_p10 = pnand %p1567_p9, %p1566_p8  ;;  %p1573_p2 = por %p1572_p0, %p1571_p11 }
  0x37   : > { %p1569_p13 = pneg %p1568_p10 }
  0x39   : > { %p1574_p5 = pnand %p1573_p2, %p1569_p13 }
  0x3b   : > { %1577 = shalt.err (!%p1574_p5)
}
  0x3c   : > { %1420 = dma.hbm_to_vmem [thread:$0]  (!%p1846_p7), %s521_s15, 64, %s523_s16, %s511_s26  }
  0x3d   : > { %531 = sbr.rel (%p1792_p3) target bundleno = 2222 (0x8ae), region = 88  ;;  %s1863_s1 = sand.u32 (!%p1792_p3), 1, %s1655_s25  }
  0x3e   : > { %s1313_s29 = sshll.u32 (!%p1792_p3), %s1863_s1, 2  ;;  %s534_s19 = scalar_lea.sflag (!%p1792_p3), [#allocation3], %s1863_s1 }
  0x3f   : > { %s537_s7 = scalar_lea.vmem (!%p1792_p3), [#allocation2], %s1313_s29 }
  0x42   : > { %1638 = dma.done.wait (%p1825_p12), %s534_s19, 64  }
  0x43   : > { %1640 = vsyncadd (%p1825_p12), %s534_s19, 4294967232 }
  0x44   : > { %1642 = dma.done.wait (%p55_p1), [#allocation6], 512  }
  0x45   : > { %1644 = vsyncadd (%p55_p1), [#allocation6], 4294966784  ;;  %s2078_s26 = sld [smem:[#allocation19_spill]]  ;;  %v1389_v1 = vld [vmem:[%s2030_s3 + $0x8] sm:$0xff]  ;;  %v1388_v3 = vld [vmem:[%s2030_s3] sm:$0xff]  ;;  %vm622_vm0 = vcmask 261120  }
  0x46   : > { %665 = vmatpush.bf16.msra.mxu1 %v1389_v1  ;;  %v1889_v4 = vld [vmem:[%s537_s7] sm:$0xf]  ;;  %s2080_s2 = sld [smem:[#allocation20_spill]]  ;;  %vm712_vm1 = vcmask 64512   ;;  %s1669_s7 = smov 112   ;;  %v1391_v20 = vld [vmem:[%s2032_s5 + $0x8] sm:$0xff] }
  0x47   : > { %v1472_v6 = vld [vmem:[%s2031_s4] ss:$0 sm:$0xff]  ;;  %s1670_s16 = smov 120   ;;  %698 = vmatpush.bf16.msra.mxu2 %v1391_v20  ;;  %vm748_vm2 = vcmask 1043456   ;;  %v708_v53 = vld [vmem:[#allocation5] sm:$0xf] }
  0x48   : > { %v1390_v22 = vld [vmem:[%s2032_s5] sm:$0xff]  ;;  %v856_v54 = vsel %vm748_vm2, %v708_v53, 0  ;;  %vm1147_vm7 = vcmask 523264   ;;  %s2081_s20 = sld [smem:[#allocation23_spill]]  ;;  %vm1198_vm11 = vcmask 257024  }
  0x49   : > { %v1473_v46 = vld [vmem:[%s2033_s6] ss:$0 sm:$0xff]  ;;  %s2082_s0 = sld [smem:[#allocation24_spill]] }
  0x4a   : > { %666 = vmatpush.bf16.msra.mxu1 %v1388_v3  ;;  %s2083_s17 = sld [smem:[#allocation25_spill]] }
  0x4b   : > { %s2079_s18 = smov %s2078_s26  ;;  %v1387_v0 = vld [vmem:[%s2078_s26 + $0x8] sm:$0xff]  ;;  %s1671_s26 = smov 104   ;;  %699 = vmatpush.bf16.msra.mxu2 %v1390_v22 }
  0x4c   : > { %v1386_v2 = vld [vmem:[%s2079_s18] sm:$0xff]  ;;  %632 = vmatpush.bf16.msra.mxu0 %v1387_v0 }
  0x4d   : > { %1334 = vmatmul.msk.bf16.vlgmr.msra.gmra.mxu1 %vm622_vm0, %v1889_v4  ;;  %v1471_v5 = vld [vmem:[%s2080_s2] ss:$0 sm:$0xff] }
  0x4e   : > { %1343 = vmatmul.msk.bf16.vlgmr.msra.gmra.mxu2 %vm622_vm0, %v1889_v4 }
  0x50   : > { %633 = vmatpush.bf16.msra.mxu0 %v1386_v2 }
  0x53   : > { %1325 = vmatmul.msk.bf16.vlgmr.msra.gmra.mxu0 %vm622_vm0, %v1889_v4 }
  0xca   : > { %v668_v8 = vpop.f32.mrf.mxu1 }
  0xcb   : > { %v669_v10 = vadd.f32 %v1472_v6, %v668_v8 }
  0xcd   : > { %v706_v11 = vpack.c.bf16 %v669_v10, %v669_v10 }
  0xcf   : > { %v772_v13 = vunpack.c.l.b16 %v706_v11  ;;  %v717_v14 = vsel %vm712_vm1, %v706_v11, 0 }
  0xd0   : > { %v635_v7 = vpop.f32.mrf.mxu0  ;;  %726 = vmatpush.bf16.xpose.msra.mxu3 %v717_v14 }
  0xd1   : > { %v636_v9 = vadd.f32 %v1471_v5, %v635_v7  ;;  %v773_v15 = vpack.c.b16 %v772_v13, %v772_v13  ;;  %v701_v45 = vpop.f32.mrf.mxu2 }
  0xd2   : > { %v670_v17 = vpop.f32.mrf.mxu1  ;;  %v702_v48 = vadd.f32 %v1473_v46, %v701_v45 }
  0xd3   : > { %v705_v12 = vpack.c.bf16 %v636_v9, %v636_v9  ;;  %873 = vrot.lane.b32.xlu2 %v773_v15, %s1669_s7  ;;  %774 = vrot.lane.b32.xlu1 %v773_v15, %s1670_s16 }
  0xd4   : > { %v707_v49 = vpack.c.bf16 %v702_v48, %v702_v48 }
  0xd5   : > { %v767_v18 = vunpack.c.l.b16 %v705_v12 }
  0xd6   : > { %v750_v50 = vsel %vm748_vm2, %v707_v49, 0  ;;  %v809_v5 = vunpack.c.l.b16 %v707_v49 }
  0xd7   : > { %v768_v19 = vpack.c.b16 %v767_v18, %v767_v18  ;;  %1344 = vmatmul.msk.bf16.vlgmr.msra.gmra.mxu3 %vm712_vm1, %v705_v12  ;;  %759 = vmatpush.bf16.msrb.mxu0 %v750_v50 }
  0xd8   : > { %v637_v16 = vpop.f32.mrf.mxu0  ;;  %v810_v7 = vpack.c.b16 %v809_v5, %v809_v5 }
  0xd9   : > { %v703_v47 = vpop.f32.mrf.mxu2 }
  0xdb   : > { %871 = vrot.lane.b32.xlu2 %v768_v19, %s1669_s7  ;;  %769 = vrot.lane.b32.xlu1 %v768_v19, %s1670_s16 }
  0xdc   : > { %865 = vmatpush.bf16.msra.mxu0 %v856_v54 }
  0xe3   : > { %949 = vrot.lane.b32.xlu1 %v768_v19, %s1671_s26 }
 0x12d   : > { %v874_v21 = vpop.permute.xlu2 %873 }
 0x12e   : > { %v879_v25 = vsel %vm712_vm1, %v874_v21, 0 }
 0x135   : > { %v872_v29 = vpop.permute.xlu2 %871 }
 0x145   : > { %v775_v23 = vpop.permute.xlu1 %774 }
 0x146   : > { %v780_v24 = vsel %vm712_vm1, %v775_v23, 0 }
 0x147   : > { %789 = vmatpush.bf16.xpose.msrb.mxu1 %v780_v24  ;;  %v709_v24 = vld [vmem:[#allocation5 + $0x4] sm:$0xf] }
 0x14d   : > { %v770_v26 = vpop.permute.xlu1 %769 }
 0x14e   : > { %1346 = vmatmul.msk.bf16.vlgmr.msrb.gmra.mxu1 %vm712_vm1, %v770_v26  ;;  %v710_v26 = vld [vmem:[#allocation5 + $0x8] sm:$0xf] }
 0x14f   : > { %888 = vmatpush.bf16.xpose.msra.mxu1 %v879_v25  ;;  %v837_v25 = vsel %vm748_vm2, %v709_v24, 0 }
 0x150   : > { %846 = vmatpush.bf16.msrb.mxu3 %v837_v25 }
 0x155   : > { %v950_v56 = vpop.permute.xlu1 %949 }
 0x15a   : > { %v728_v27 = vpop.f32.mrf.mxu3 }
 0x15b   : > { %v732_v28 = vmul.f32 0.35355338, %v728_v27  ;;  %v933_v27 = vsel %vm748_vm2, %v710_v26, 0 }
 0x15c   : > { %942 = vmatpush.bf16.msra.mxu3 %v933_v27 }
 0x15d   : > { %v733_v30 = vsel %vm712_vm1, %v732_v28, -inf }
 0x15e   : > { %1350 = vmatmul.msk.bf16.vlgmr.msra.gmra.mxu1 %vm712_vm1, %v872_v29  ;;  %734 = vmax.xlane.f32.xlu0 %v733_v30 }
 0x162   : > { %v730_v31 = vpop.f32.mrf.mxu3 }
 0x1cb   : > { %v791_v32 = vpop.f32.mrf.mxu1 }
 0x1cc   : > { %v795_v33 = vmul.f32 0.35355338, %v791_v32 }
 0x1ce   : > { %v796_v34 = vsel %vm712_vm1, %v795_v33, -inf }
 0x1cf   : > { %797 = vmax.xlane.f32.xlu2 %v796_v34 }
 0x1d1   : > { %v735_v35 = vpop.xlane.xlu0 %734 }
 0x1d2   : > { %v736_v36 = vsub.f32 %v732_v28, %v735_v35 }
 0x1d3   : > { %v793_v37 = vpop.f32.mrf.mxu1 }
 0x1d4   : > { %v737_v38 = vmul.f32 1.442695, %v736_v36 }
 0x1d6   : > { %1481 = vpow2.f32 %v737_v38 }
 0x1db   : > { %v890_v39 = vpop.f32.mrf.mxu1 }
 0x1dc   : > { %v1482_v40 = vpop.eup %1481  ;;  %v894_v41 = vmul.f32 0.35355338, %v890_v39 }
 0x1dd   : > { %v739_v42 = vsel %vm712_vm1, %v1482_v40, 0.0 }
 0x1de   : > { %740 = vadd.xlane.f32.xlu0 %v739_v42  ;;  %v895_v43 = vsel %vm712_vm1, %v894_v41, -inf }
 0x1df   : > { %896 = vmax.xlane.f32.xlu1 %v895_v43 }
 0x1e3   : > { %v892_v44 = vpop.f32.mrf.mxu1 }
 0x1f2   : > { %951 = vrot.lane.b32.xlu0 %v773_v15, %s1671_s26 }
 0x242   : > { %v798_v51 = vpop.xlane.xlu2 %797 }
 0x243   : > { %v799_v52 = vsub.f32 %v795_v33, %v798_v51 }
 0x245   : > { %v800_v55 = vmul.f32 1.442695, %v799_v52 }
 0x247   : > { %1483 = vpow2.f32 %v800_v55 }
 0x24d   : > { %v1484_v57 = vpop.eup %1483 }
 0x24e   : > { %v802_v58 = vsel %vm712_vm1, %v1484_v57, 0.0 }
 0x24f   : > { %803 = vadd.xlane.f32.xlu2 %v802_v58 }
 0x251   : > { %v741_v59 = vpop.xlane.xlu0 %740 }
 0x252   : > { %1485 = vrcp.f32 %v741_v59  ;;  %v897_v60 = vpop.xlane.xlu1 %896 }
 0x253   : > { %v898_v61 = vsub.f32 %v894_v41, %v897_v60 }
 0x255   : > { %v899_v62 = vmul.f32 1.442695, %v898_v61 }
 0x257   : > { %1487 = vpow2.f32 %v899_v62  ;;  %v1474_v62 = vld [vmem:[%s2035_s8] ss:$0 sm:$0xff] }
 0x258   : > { %v1486_v63 = vpop.eup %1485 }
 0x259   : > { %v743_v0 = vmul.f32 %v1486_v63, %v1482_v40 }
 0x25b   : > { %v744_v1 = vpack.c.bf16 %v743_v0, %v743_v0 }
 0x25d   : > { %v1488_v2 = vpop.eup %1487  ;;  %1345 = vmatmul.msk.bf16.vlgmr.msrb.gmra.mxu0 %vm712_vm1, %v744_v1  ;;  %v601_v1 = vunpack.c.l.bf16 %v1889_v4 }
 0x25e   : > { %v901_v3 = vsel %vm712_vm1, %v1488_v2, 0.0 }
 0x25f   : > { %902 = vadd.xlane.f32.xlu1 %v901_v3 }
 0x264   : > { %v952_v6 = vpop.permute.xlu0 %951 }
 0x265   : > { %v957_v8 = vsel %vm712_vm1, %v952_v6, 0 }
 0x266   : > { %966 = vmatpush.bf16.xpose.msrb.mxu0 %v957_v8 }
 0x267   : > { %811 = vrot.lane.b32.xlu2 %v810_v7, %s1670_s16  ;;  %s1383_s16 = sshll.u32 %s1787_s30, 2  ;;  %s598_s30 = scalar_lea.vmem [#allocation8], %s1313_s29 }
 0x268   : > { %s1211_s19 = scalar_lea.hbm %s2083_s17, %s1383_s16  ;;  %s1613_s29 = scalar_lea.hbm %s2083_s17, 8 }
 0x269   : > { %s1215_s2 = sshll.u32 %s1211_s19, 4  ;;  %s1216_s2 = int_to_ptr.hbm [resolvable:$true] %s1215_s2 }
 0x26a   : > { %s1607_s9 = sshra.s32 %s1216_s2, 4  ;;  %s1608_s9 = int_to_ptr.hbm [resolvable:$true] %s1607_s9 }
 0x26b   : > { %p1614_p12 = scmp.lt.s32.totalorder %s1608_s9, %s2083_s17 }
 0x278   : > { %907 = vrot.lane.b32.xlu1 %v810_v7, %s1669_s7  ;;  %s1213_s7 = sshll.u32 %s598_s30, 4  ;;  %s1214_s7 = int_to_ptr.vmem [resolvable:$true] %s1213_s7 }
 0x2c2   : > { %v804_v9 = vpop.xlane.xlu2 %803 }
 0x2c3   : > { %1489 = vrcp.f32 %v804_v9 }
 0x2c9   : > { %v1490_v10 = vpop.eup %1489 }
 0x2ca   : > { %v806_v11 = vmul.f32 %v1490_v10, %v1484_v57  ;;  %v812_v12 = vpop.permute.xlu2 %811  ;;  %v711_v57 = vld [vmem:[#allocation5 + $0xc] sm:$0xf] }
 0x2cb   : > { %v817_v13 = vsel %vm748_vm2, %v812_v12, 0  ;;  %v1011_v58 = vsel %vm748_vm2, %v711_v57, 0 }
 0x2cc   : > { %826 = vmatpush.bf16.msrb.mxu2 %v817_v13  ;;  %v807_v14 = vpack.c.bf16 %v806_v11, %v806_v11 }
 0x2cf   : > { %1347 = vmatmul.msk.bf16.vlgmr.msrb.gmra.mxu2 %vm712_vm1, %v807_v14 }
 0x2d2   : > { %v903_v17 = vpop.xlane.xlu1 %902 }
 0x2d3   : > { %1491 = vrcp.f32 %v903_v17 }
 0x2d9   : > { %v1492_v19 = vpop.eup %1491 }
 0x2da   : > { %v761_v15 = vpop.f32.mrf.mxu0  ;;  %v905_v20 = vmul.f32 %v1492_v19, %v1488_v2  ;;  %v1392_v19 = vld [vmem:[#allocation7] sm:$0xff] }
 0x2db   : > { %v765_v16 = vpack.c.bf16 %v761_v15, %v761_v15 }
 0x2dc   : > { %v906_v23 = vpack.c.bf16 %v905_v20, %v905_v20  ;;  %v1397_v20 = vld [vmem:[%s2038_s11 + $0x18] sm:$0xff] }
 0x2dd   : > { %1349 = vmatmul.msk.bf16.vlgmr.msra.gmra.mxu0 %vm712_vm1, %v765_v16 }
 0x2de   : > { %1155 = vmatpush.bf16.msra.mxu0 %v1397_v20 }
 0x2e2   : > { %v763_v18 = vpop.f32.mrf.mxu0 }
 0x2e3   : > { %v1393_v18 = vld [vmem:[#allocation7 + $0x8] sm:$0xff] }
 0x2ea   : > { %v908_v21 = vpop.permute.xlu1 %907 }
 0x2eb   : > { %v913_v22 = vsel %vm748_vm2, %v908_v21, 0 }
 0x2ec   : > { %922 = vmatpush.bf16.msra.mxu2 %v913_v22 }
 0x2ed   : > { %1353 = vmatmul.msk.bf16.vlgmr.msrb.gmra.mxu0 %vm712_vm1, %v950_v56 }
 0x2ef   : > { %1351 = vmatmul.msk.bf16.vlgmr.msra.gmra.mxu2 %vm712_vm1, %v906_v23  ;;  %v1396_v23 = vld [vmem:[%s2038_s11 + $0x10] sm:$0xff] }
 0x2f0   : > { %1020 = vmatpush.bf16.msrb.mxu2 %v1011_v58  ;;  %1156 = vmatpush.bf16.msra.mxu0 %v1396_v23 }
 0x352   : > { %v828_v28 = vpop.f32.mrf.mxu2 }
 0x353   : > { %v832_v29 = vpack.c.bf16 %v828_v28, %v828_v28 }
 0x355   : > { %1348 = vmatmul.msk.bf16.vlgmr.msrb.gmra.mxu3 %vm712_vm1, %v832_v29 }
 0x356   : > { %1102 = vmatpush.bf16.msrb.mxu3 %v1393_v18 }
 0x35a   : > { %v830_v30 = vpop.f32.mrf.mxu2  ;;  %v867_v31 = vpop.f32.mrf.mxu0  ;;  %1103 = vmatpush.bf16.msrb.mxu3 %v1392_v19 }
 0x362   : > { %v869_v32 = vpop.f32.mrf.mxu0 }
 0x36a   : > { %v968_v33 = vpop.f32.mrf.mxu0 }
 0x36b   : > { %v972_v34 = vmul.f32 0.35355338, %v968_v33  ;;  %v1476_v33 = vld [vmem:[%s2041_s14] ss:$0 sm:$0xff] }
 0x36d   : > { %v973_v35 = vsel %vm712_vm1, %v972_v34, -inf }
 0x36e   : > { %974 = vmax.xlane.f32.xlu0 %v973_v35 }
 0x372   : > { %v924_v36 = vpop.f32.mrf.mxu2  ;;  %v970_v37 = vpop.f32.mrf.mxu0 }
 0x373   : > { %v928_v38 = vpack.c.bf16 %v924_v36, %v924_v36 }
 0x375   : > { %1352 = vmatmul.msk.bf16.vlgmr.msra.gmra.mxu3 %vm712_vm1, %v928_v38  ;;  %v1395_v38 = vld [vmem:[%s2038_s11 + $0x8] sm:$0xff] }
 0x376   : > { %1157 = vmatpush.bf16.msra.mxu0 %v1395_v38 }
 0x37a   : > { %v926_v39 = vpop.f32.mrf.mxu2 }
 0x37b   : > { %v1394_v39 = vld [vmem:[%s2038_s11] sm:$0xff] }
 0x37c   : > { %1158 = vmatpush.bf16.msra.mxu0 %v1394_v39 }
 0x3d8   : > { %v848_v40 = vpop.f32.mrf.mxu3 }
 0x3d9   : > { %v868_v47 = vadd.f32 %v867_v31, %v848_v40  ;;  %v1475_v31 = vld [vmem:[%s2040_s13] ss:$0 sm:$0xff] }
 0x3da   : > { %v1477_v40 = vld [vmem:[%s2037_s10] ss:$0 sm:$0xff] }
 0x3e0   : > { %v850_v41 = vpop.f32.mrf.mxu3 }
 0x3e1   : > { %v975_v42 = vpop.xlane.xlu0 %974 }
 0x3e2   : > { %v976_v43 = vsub.f32 %v972_v34, %v975_v42 }
 0x3e4   : > { %v977_v44 = vmul.f32 1.442695, %v976_v43 }
 0x3e6   : > { %1493 = vpow2.f32 %v977_v44 }
 0x3ec   : > { %v1494_v45 = vpop.eup %1493 }
 0x3ed   : > { %v979_v46 = vsel %vm712_vm1, %v1494_v45, 0.0 }
 0x3ee   : > { %980 = vadd.xlane.f32.xlu0 %v979_v46  ;;  %v1478_v46 = vld [vmem:[%s2039_s12] ss:$0 sm:$0xff] }
 0x3f8   : > { %v944_v48 = vpop.f32.mrf.mxu3 }
 0x3f9   : > { %v948_v49 = vadd.f32 %v944_v48, %v868_v47 }
 0x400   : > { %v946_v50 = vpop.f32.mrf.mxu3 }
 0x402   : > { %985 = vrot.lane.b32.xlu0 %v810_v7, %s1671_s26  ;;  %v1672_v7 = vmov 32.0   ;;  %s1201_s26 = scalar_lea.sflag [#allocation4], %s1863_s1 }
 0x461   : > { %v981_v51 = vpop.xlane.xlu0 %980 }
 0x462   : > { %1495 = vrcp.f32 %v981_v51 }
 0x463   : > { %1497 = vrcp.f32 %v1672_v7 }
 0x468   : > { %v1496_v52 = vpop.eup %1495 }
 0x469   : > { %v983_v53 = vmul.f32 %v1496_v52, %v1494_v45  ;;  %v1498_v8 = vpop.eup %1497 }
 0x46a   : > { %v1037_v9 = vmul.f32 32.0, %v1498_v8  ;;  %vm1041_vm3 = vweird.f32 %v1498_v8 }
 0x46b   : > { %v984_v56 = vpack.c.bf16 %v983_v53, %v983_v53 }
 0x46c   : > { %v1038_v10 = vsub.f32 1.0, %v1037_v9 }
 0x46e   : > { %v1039_v11 = vmul.f32 %v1498_v8, %v1038_v10 }
 0x470   : > { %v1040_v12 = vadd.f32 %v1498_v8, %v1039_v11 }
 0x472   : > { %v1042_v13 = vsel %vm1041_vm3, %v1498_v8, %v1040_v12 }
 0x474   : > { %v986_v54 = vpop.permute.xlu0 %985 }
 0x475   : > { %v991_v55 = vsel %vm748_vm2, %v986_v54, 0 }
 0x476   : > { %1000 = vmatpush.bf16.msrb.mxu1 %v991_v55 }
 0x479   : > { %1354 = vmatmul.msk.bf16.vlgmr.msrb.gmra.mxu1 %vm712_vm1, %v984_v56 }
 0x4f6   : > { %v1002_v59 = vpop.f32.mrf.mxu1 }
 0x4f7   : > { %v1006_v60 = vpack.c.bf16 %v1002_v59, %v1002_v59 }
 0x4f9   : > { %1355 = vmatmul.msk.bf16.vlgmr.msrb.gmra.mxu2 %vm712_vm1, %v1006_v60 }
 0x4fe   : > { %v1004_v61 = vpop.f32.mrf.mxu1 }
 0x57c   : > { %v1022_v63 = vpop.f32.mrf.mxu2 }
 0x57d   : > { %v1026_v0 = vadd.f32 %v1022_v63, %v948_v49 }
 0x57f   : > { %v1031_v2 = vadd.f32 %v1474_v62, %v1026_v0 }
 0x581   : > { %v1032_v3 = vadd.f32 %v1031_v2, %v601_v1  ;;  %v1479_v2 = vld [vmem:[%s2081_s20] ss:$0 sm:$0xff]  ;;  %s1609_s20 = scalar_lea.hbm %s1608_s9, 4 }
 0x582   : > { %p1610_p1 = scmp.ne.s32.totalorder %s1608_s9, %s1609_s20  ;;  %p1615_p7 = scmp.lt.s32.totalorder %s1613_s29, %s1609_s20 }
 0x583   : > { %v1033_v5 = vsel %vm622_vm0, %v1032_v3, 0.0 }
 0x584   : > { %v1024_v6 = vpop.f32.mrf.mxu2  ;;  %1034 = vadd.xlane.f32.xlu2 %v1033_v5  ;;  %v1480_v5 = vld [vmem:[%s2082_s0] ss:$0 sm:$0xff]  ;;  %p1611_p3 = pnand %p1610_p1, %p1832_p4  ;;  %p1616_p8 = por %p1615_p7, %p1614_p12 }
 0x586   : > { %p1612_p5 = pneg %p1611_p3 }
 0x588   : > { %p1617_p9 = pnand %p1616_p8, %p1612_p5 }
 0x5f7   : > { %v1035_v14 = vpop.xlane.xlu2 %1034 }
 0x5f8   : > { %v1043_v15 = vmul.f32 %v1042_v13, %v1035_v14 }
 0x5fa   : > { %v1044_v16 = vsub.f32 %v1032_v3, %v1043_v15 }
 0x5fc   : > { %v1045_v17 = vmul.f32 %v1044_v16, %v1044_v16 }
 0x5fe   : > { %v1046_v4 = vsel %vm622_vm0, %v1045_v17, 0.0 }
 0x5ff   : > { %1047 = vadd.xlane.f32.xlu1 %v1046_v4 }
 0x672   : > { %v1048_v21 = vpop.xlane.xlu1 %1047 }
 0x673   : > { %v1049_v22 = vmul.f32 %v1048_v21, %v1042_v13 }
 0x675   : > { %v1050_v24 = vadd.f32 1e-05, %v1049_v22 }
 0x677   : > { %1499 = vrsqrt.f32 %v1050_v24  ;;  %vm1057_vm5 = vweird.f32 %v1050_v24 }
 0x67d   : > { %v1500_v25 = vpop.eup %1499 }
 0x67e   : > { %v1052_v26 = vmul.f32 %v1500_v25, %v1050_v24  ;;  %vm1058_vm4 = vweird.f32 %v1500_v25 }
 0x67f   : > { %vm1059_vm6 = vmor %vm1057_vm5, %vm1058_vm4 }
 0x680   : > { %v1053_v27 = vmul.f32 %v1500_v25, %v1052_v26 }
 0x682   : > { %v1054_v28 = vmul.f32 0.5, %v1053_v27 }
 0x684   : > { %v1055_v29 = vsub.f32 1.5, %v1054_v28 }
 0x686   : > { %v1056_v30 = vmul.f32 %v1500_v25, %v1055_v29 }
 0x688   : > { %v1060_v32 = vsel %vm1059_vm6, %v1500_v25, %v1056_v30 }
 0x689   : > { %v1061_v34 = vmul.f32 %v1060_v32, %v1044_v16 }
 0x68b   : > { %v1066_v35 = vmul.f32 %v1475_v31, %v1061_v34 }
 0x68d   : > { %v1071_v36 = vadd.f32 %v1476_v33, %v1066_v35 }
 0x68f   : > { %v1072_v37 = vpack.c.bf16 %v1071_v36, %v1071_v36 }
 0x691   : > { %1364 = vmatmul.msk.bf16.vlgmr.msrb.gmra.mxu3 %vm622_vm0, %v1072_v37 }
 0x714   : > { %v1105_v41 = vpop.f32.mrf.mxu3 }
 0x715   : > { %v1106_v42 = vadd.f32 %v1477_v40, %v1105_v41 }
 0x717   : > { %v1109_v43 = vmax.f32 %v1106_v42, 0.0 }
 0x719   : > { %v1110_v44 = vpack.c.bf16 %v1109_v43, %v1109_v43 }
 0x71b   : > { %1381 = vmatmul.msk.bf16.vlgmr.msra.gmra.mxu0 %vm1147_vm7, %v1110_v44 }
 0x71c   : > { %v1107_v45 = vpop.f32.mrf.mxu3 }
 0x798   : > { %v1160_v47 = vpop.f32.mrf.mxu0 }
 0x799   : > { %v1161_v48 = vadd.f32 %v1478_v46, %v1160_v47 }
 0x79b   : > { %v1164_v49 = vadd.f32 %v1161_v48, %v1071_v36 }
 0x79d   : > { %v1165_v50 = vsel %vm622_vm0, %v1164_v49, 0.0 }
 0x79e   : > { %1166 = vadd.xlane.f32.xlu0 %v1165_v50 }
 0x7a0   : > { %v1162_v51 = vpop.f32.mrf.mxu0 }
 0x811   : > { %v1167_v52 = vpop.xlane.xlu0 %1166 }
 0x812   : > { %v1168_v53 = vmul.f32 %v1167_v52, %v1042_v13 }
 0x814   : > { %v1169_v54 = vsub.f32 %v1164_v49, %v1168_v53 }
 0x816   : > { %v1170_v55 = vmul.f32 %v1169_v54, %v1169_v54 }
 0x818   : > { %v1171_v56 = vsel %vm622_vm0, %v1170_v55, 0.0 }
 0x819   : > { %1172 = vadd.xlane.f32.xlu2 %v1171_v56 }
 0x88c   : > { %v1173_v57 = vpop.xlane.xlu2 %1172 }
 0x88d   : > { %v1174_v58 = vmul.f32 %v1173_v57, %v1042_v13 }
 0x88f   : > { %v1175_v59 = vadd.f32 1e-05, %v1174_v58 }
 0x891   : > { %1501 = vrsqrt.f32 %v1175_v59  ;;  %vm1182_vm9 = vweird.f32 %v1175_v59 }
 0x897   : > { %v1502_v60 = vpop.eup %1501 }
 0x898   : > { %v1177_v61 = vmul.f32 %v1502_v60, %v1175_v59  ;;  %vm1183_vm8 = vweird.f32 %v1502_v60 }
 0x899   : > { %vm1184_vm10 = vmor %vm1182_vm9, %vm1183_vm8 }
 0x89a   : > { %v1178_v62 = vmul.f32 %v1502_v60, %v1177_v61 }
 0x89c   : > { %v1179_v63 = vmul.f32 0.5, %v1178_v62 }
 0x89e   : > { %v1180_v0 = vsub.f32 1.5, %v1179_v63 }
 0x8a0   : > { %v1181_v1 = vmul.f32 %v1502_v60, %v1180_v0 }
 0x8a2   : > { %v1185_v3 = vsel %vm1184_vm10, %v1502_v60, %v1181_v1 }
 0x8a3   : > { %v1186_v6 = vmul.f32 %v1185_v3, %v1169_v54 }
 0x8a5   : > { %v1191_v7 = vmul.f32 %v1479_v2, %v1186_v6 }
 0x8a7   : > { %v1196_v8 = vadd.f32 %v1480_v5, %v1191_v7 }
 0x8a9   : > { %v1197_v9 = vpack.c.bf16 %v1196_v8, %v1196_v8 }
 0x8ab   : > { %1199 = vst.msk [vmem:[%s598_s30] sm:$0xf] %vm1198_vm11, %v1197_v9 }
 0x8ac   : > { %1620 = shalt.err (!%p1617_p9)
}
 0x8ad   : > { %1408 = dma.vmem_to_hbm [thread:$0]  (%p1832_p4), %s1214_s7, 64, %s1216_s2, %s1201_s26  }
 0x8ae PF: > { %s2085_s1 = sld [smem:[#allocation12_spill]]  ;;  %p2087_p10 = scmp.ge.s32.totalorder %s1663_s27, 2 }
 0x8b0   : > { %p1422_p13 = pnand %p2087_p10, %p1836_p6 }
 0x8b2   : > { %p1423_p11 = pneg %p1422_p13 }
 0x8b4   : > { %s1227_s28 = sand.u32 1, %s2085_s1  }
 0x8b5   : > { %s1228_s19 = scalar_lea.sflag [#allocation4], %s1227_s28 }
 0x8b6   : > { %1646 = dma.done.wait (%p1423_p11), %s1228_s19, 64  }
 0x8b7   : > { %1648 = vsyncadd (%p1423_p11), %s1228_s19, 4294967232  ;;  %s2088_s27 = sld [smem:[#allocation14_spill]]  ;;  %s2091_s24 = smov %s1655_s25 }
 0x8b8   : > { %s2089_s30 = sld [smem:[#allocation13_spill]] }
 0x8b9   : > { %s2090_s26 = sld [smem:[#allocation15_spill]] }
 0x8bd   : > { %p31_p0 = scmp.ge.s32.totalorder %s2088_s27, 4  }
 0x8be   : > { %s2092_s25 = smov %s2089_s30 }
 0x8bf   :  { %33 = sbr.rel (!%p31_p0) target bundleno = 15 (0xf), region = 141 }
 0x8c4   :  { %1234 = vsyncpa [#allocation3], 1 }
 0x8c5   :  { %1236 = vsyncpa [#allocation3 + $0x1], 1 }
 0x8c6   :  { %1237 = vsyncpa [#allocation6], 1 }
 0x8c7   :  { %1238 = vsyncpa [#allocation4], 1 }
 0x8c8   :  { %1240 = vsyncpa [#allocation4 + $0x1], 1 }

</bundles_post_ra>
